<compile_context>
chip_gen: v7x
topology: tpu7x:2x2x1
jax: 0.10.0
libtpu: 0.0.40
codegen_flags: <defaults>
</compile_context>

<pallas_src>
import functools

import numpy as np
import jax
import jax.numpy as jnp
from jax.experimental import pallas as pl
from jax.experimental.pallas import tpu as pltpu

# ---------------- KAN configuration (KANLinear defaults) ---------------------
SPLINE_ORDER = 3
GRID_SIZE = 5
GRID_RANGE = (-1.0, 1.0)
GK = GRID_SIZE + SPLINE_ORDER            # B-spline bases per input feature

# Knot vector as *Python floats* -> inline scalar constants inside the kernel.
_H = (GRID_RANGE[1] - GRID_RANGE[0]) / GRID_SIZE
KNOTS = [GRID_RANGE[0] + (i - SPLINE_ORDER) * _H
         for i in range(GRID_SIZE + 2 * SPLINE_ORDER + 1)]          # len = G + 2K + 1


def _cdiv(a, b):
    return -(-a // b)


# --------------------------- in-kernel KAN math -------------------------------
def _bspline_bases(s):
    """Knot-major Cox-de Boor recursion.

    s : (tb, C) f32.  Returns a list of GK lane-dense (tb, C) arrays (order-K bases).
    All knot constants are Python floats (no captured arrays).
    """
    nb = len(KNOTS) - 1
    bases = [((s >= KNOTS[j]) & (s < KNOTS[j + 1])).astype(jnp.float32)
             for j in range(nb)]
    for k in range(1, SPLINE_ORDER + 1):
        nxt = []
        for j in range(len(bases) - 1):
            inv_l = 1.0 / (KNOTS[j + k] - KNOTS[j])
            inv_r = 1.0 / (KNOTS[j + k + 1] - KNOTS[j + 1])
            nxt.append((s - KNOTS[j]) * inv_l * bases[j]
                       + (KNOTS[j + k + 1] - s) * inv_r * bases[j + 1])
        bases = nxt
    return bases                                        # GK arrays of (tb, C)


def _kan_linear(s, bw_ref, sw_ref, slab_ref):
    """One KANLinear layer on s: (tb, C) f32.

    bw_ref   : (C_in, C_out)       == base_weight.T
    sw_ref   : (GK*C_in, C_out)    == scaled_spline_weight fused (row = g*C_in + in)
    slab_ref : (tb, GK*C_in) f32 VMEM scratch for the order-K bases (single fused matmul)
    """
    c = s.shape[-1]
    base = jnp.dot(jax.nn.silu(s), bw_ref[...], preferred_element_type=jnp.float32)
    bases = _bspline_bases(s)
    for g in range(GK):                                  # stage bases into the VMEM slab
        slab_ref[:, g * c:(g + 1) * c] = bases[g]
    spline = jnp.dot(slab_ref[...], sw_ref[...],         # ONE matmul, K = GK*C
                     preferred_element_type=jnp.float32)
    return base + spline


# ------------------------------- kernel ---------------------------------------
def kanblock_kernel(x_ref, bw1_ref, sw1_ref, bw2_ref, sw2_ref, out_ref, slab_ref,
                    *, inv_hw):
    x = x_ref[...]                                         # (tb, C, HW), native dtype
    # adaptive_avg_pool2d: spatial mean; accumulate in f32 even for bf16 inputs.
    score = jnp.sum(x, axis=-1, dtype=jnp.float32) * inv_hw      # (tb, C) f32
    score = _kan_linear(score, bw1_ref, sw1_ref, slab_ref)       # kan_layer_01
    score = _kan_linear(score, bw2_ref, sw2_ref, slab_ref)       # kan_layer_02
    scale = (score + 1.0).astype(x.dtype)                  # fold residual: x*score + x
    out_ref[...] = x * scale[:, :, None]


# ------------------------------ wrapper ----------------------------------------
def kan_block(x_nchw, params, *, tb=None):
    B, C, H, W = x_nchw.shape
    HW = H * W
    x = x_nchw.reshape(B, C, HW)                      # keep NATIVE dtype (no f32 cast)
    dtype = x.dtype

    row_bytes = C * HW * jnp.dtype(dtype).itemsize
    weight_bytes = 2 * (C * C + GK * C * C) * 4       # both layers, single-buffered
    slab_bytes = GK * C * 4                           # per tb row of scratch

    # Generation-aware VMEM budget (v7x: 64 MiB, v5e/v6e: 128 MiB physical).
    try:
        vmem_cap = int(pltpu.get_tpu_info().vmem_capacity_bytes)
    except Exception:
        vmem_cap = 64 << 20                           # conservative fallback (v7x size)
    usable = max(vmem_cap - (16 << 20), 16 << 20)     # headroom for compiler scratch/sems

    if tb is None:
        # In & out x blocks are double-buffered by the pipeline -> 4 live copies.
        block_budget = (usable - weight_bytes) // 4
        block_budget = int(min(max(block_budget, 1 << 20), 24 << 20))
        tb = max(1, min(B, block_budget // max(row_bytes, 1)))
        if B >= 2:
            steps = max(2, _cdiv(B, tb))              # keep both v7x TCs busy
            if steps % 2 and steps < B:
                steps += 1                            # even split across the two TCs
            tb = _cdiv(B, steps)
    grid = (_cdiv(B, tb),)                            # ragged final block handled by Pallas

    need = 4 * tb * row_bytes + weight_bytes + tb * slab_bytes + (2 << 20)
    vmem_limit = int(min(max(need, 16 << 20), usable))

    def _wspec(shape):
        # Grid-invariant weights: single-buffer them (their index_map is constant).
        try:
            return pl.BlockSpec(shape, lambda i: (0,) * len(shape),
                                pipeline_mode=pl.Buffered(1))
        except Exception:                              # older BlockSpec signature
            return pl.BlockSpec(shape, lambda i: (0,) * len(shape))

    out = pl.pallas_call(
        functools.partial(kanblock_kernel, inv_hw=1.0 / HW),   # logical H*W, not block
        out_shape=jax.ShapeDtypeStruct((B, C, HW), dtype),
        grid_spec=pltpu.PrefetchScalarGridSpec(
            num_scalar_prefetch=0,
            grid=grid,
            in_specs=[
                pl.BlockSpec((tb, C, HW), lambda i: (i, 0, 0)),
                _wspec((C, C)),
                _wspec((GK * C, C)),
                _wspec((C, C)),
                _wspec((GK * C, C)),
            ],
            out_specs=pl.BlockSpec((tb, C, HW), lambda i: (i, 0, 0)),
            scratch_shapes=[pltpu.VMEM((tb, GK * C), jnp.float32)],
        ),
        compiler_params=pltpu.CompilerParams(
            dimension_semantics=("parallel",),          # megacore sharding on v7x
            vmem_limit_bytes=vmem_limit,
        ),
    )(x, params["bw1_t"], params["sw1_f"], params["bw2_t"], params["sw2_f"])
    return out.reshape(B, C, H, W)


# ----------------------- deterministic parameter init --------------------------
def init_params(key, c):
    keys = jax.random.split(key, 6)

    def layer(kb, kw, kc):
        base_w = jax.random.uniform(kb, (c, c), jnp.float32, -0.5, 0.5)       # (out, in)
        spline_w = jax.random.normal(kw, (c, c, GK), jnp.float32) * 0.1       # (out, in, GK)
        scaler = jax.random.uniform(kc, (c, c), jnp.float32, -0.5, 0.5)       # (out, in)
        scaled = spline_w * scaler[:, :, None]                                # scaled_spline_weight
        return base_w, scaled

    bw1, ssw1 = layer(keys[0], keys[1], keys[2])
    bw2, ssw2 = layer(keys[3], keys[4], keys[5])

    def fuse(ssw):
        # (out, in, GK) -> (GK, in, out) -> (GK*in, out): row index = g*C_in + in,
        # matching the g-major staging order of the in-kernel basis slab.
        return jnp.transpose(ssw, (2, 1, 0)).reshape(GK * ssw.shape[1], ssw.shape[0])

    params = dict(bw1_t=bw1.T, sw1_f=fuse(ssw1),
                  bw2_t=bw2.T, sw2_f=fuse(ssw2))
    raw = (bw1, ssw1, bw2, ssw2)
    return raw, params


# -------------------------- pure-JAX reference ----------------------------------
def _kan_linear_ref(s, base_w, scaled_sw):
    """efficient-KAN KANLinear in its native (out, in[, GK]) layout."""
    knots = jnp.asarray(KNOTS, dtype=jnp.float32)
    base = jax.nn.silu(s) @ base_w.T
    xk = s[:, :, None]
    bases = ((xk >= knots[:-1]) & (xk < knots[1:])).astype(s.dtype)
    for k in range(1, SPLINE_ORDER + 1):
        bases = ((xk - knots[:-(k + 1)]) / (knots[k:-1] - knots[:-(k + 1)]) * bases[..., :-1]
                 + (knots[k + 1:] - xk) / (knots[k + 1:] - knots[1:-k]) * bases[..., 1:])
    Bn = s.shape[0]
    spline = bases.reshape(Bn, -1) @ scaled_sw.reshape(scaled_sw.shape[0], -1).T
    return base + spline


def kan_block_ref(x, bw1, ssw1, bw2, ssw2):
    B, C, H, W = x.shape
    s = jnp.mean(x.reshape(B, C, -1), axis=-1)
    s = _kan_linear_ref(s, bw1, ssw1)
    s = _kan_linear_ref(s, bw2, ssw2)
    return x * s[:, :, None, None] + x


if __name__ == "__main__":
    B, C, H, W = 2, 4, 16, 16
    key = jax.random.PRNGKey(0)
    kx, kp = jax.random.split(key)
    x = jax.random.normal(kx, (B, C, H, W), jnp.float32)
    raw, params = init_params(kp, C)

    out = kan_block(x, params)          # auto tiling -> tb=1, grid=(2,), exercises pipeline
    out = jax.block_until_ready(out)

    ref = kan_block_ref(x, *raw)
    assert out.shape == (B, C, H, W)
    np.testing.assert_allclose(np.asarray(out), np.asarray(ref), rtol=1e-4, atol=1e-4)
    print("KERNEL_OK")
</pallas_src>

<mosaic_0001>
module attributes {stable_mosaic.version = 11 : i64} {
  func.func @kanblock_kernel(%arg0: i32, %arg1: memref<1x4x256xf32, #tpu.memory_space<vmem>>, %arg2: memref<4x4xf32, #tpu.memory_space<vmem>>, %arg3: memref<32x4xf32, #tpu.memory_space<vmem>>, %arg4: memref<4x4xf32, #tpu.memory_space<vmem>>, %arg5: memref<32x4xf32, #tpu.memory_space<vmem>>, %arg6: memref<1x4x256xf32, #tpu.memory_space<vmem>>, %arg7: memref<1x32xf32, #tpu.memory_space<vmem>>) attributes {dimension_semantics = [#tpu.dimension_semantics<parallel>], iteration_bounds = array<i64: 2>, scalar_prefetch = 0 : i64, scratch_operands = 1 : i64, tpu.core_type = #tpu.core_type<tc>, window_params = [{transform_indices = @transform_0, window_bounds = array<i64: 1, 4, 256>}, {pipeline_mode = #tpu.pipeline_mode<synchronous>, transform_indices = @transform_1, window_bounds = array<i64: 4, 4>}, {pipeline_mode = #tpu.pipeline_mode<synchronous>, transform_indices = @transform_2, window_bounds = array<i64: 32, 4>}, {pipeline_mode = #tpu.pipeline_mode<synchronous>, transform_indices = @transform_3, window_bounds = array<i64: 4, 4>}, {pipeline_mode = #tpu.pipeline_mode<synchronous>, transform_indices = @transform_4, window_bounds = array<i64: 32, 4>}, {transform_indices = @transform_5, window_bounds = array<i64: 1, 4, 256>}]} {
    %c0 = arith.constant 0 : index
    %c0_0 = arith.constant 0 : index
    %c0_1 = arith.constant 0 : index
    %0 = vector.load %arg1[%c0, %c0_0, %c0_1] : memref<1x4x256xf32, #tpu.memory_space<vmem>>, vector<1x4x256xf32>
    %cst = arith.constant dense<0.000000e+00> : vector<1x4xf32>
    %1 = vector.multi_reduction <add>, %0, %cst [2] : vector<1x4x256xf32> to vector<1x4xf32>
    %cst_2 = arith.constant 3.906250e-03 : f32
    %2 = vector.broadcast %cst_2 : f32 to vector<1x4xf32>
    %3 = arith.mulf %1, %2 : vector<1x4xf32>
    %4 = arith.negf %3 : vector<1x4xf32>
    %5 = math.exp %4 : vector<1x4xf32>
    %cst_3 = arith.constant 1.000000e+00 : f32
    %6 = vector.broadcast %cst_3 : f32 to vector<1x4xf32>
    %7 = arith.addf %6, %5 : vector<1x4xf32>
    %8 = arith.divf %6, %7 : vector<1x4xf32>
    %9 = arith.mulf %3, %8 : vector<1x4xf32>
    %c0_4 = arith.constant 0 : index
    %c0_5 = arith.constant 0 : index
    %10 = vector.load %arg2[%c0_4, %c0_5] : memref<4x4xf32, #tpu.memory_space<vmem>>, vector<4x4xf32>
    %cst_6 = arith.constant dense<0.000000e+00> : vector<1x4xf32>
    %11 = tpu.matmul %9, %10, %cst_6 {dimension_numbers = #tpu.dot_dimension_numbers<[1], [0], [0], [1], [0, 0, 1, 1], [], []>} : vector<1x4xf32>, vector<4x4xf32>, vector<1x4xf32> -> vector<1x4xf32>
    %cst_7 = arith.constant -2.200000e+00 : f32
    %12 = vector.broadcast %cst_7 : f32 to vector<1x4xf32>
    %13 = arith.cmpf oge, %3, %12 : vector<1x4xf32>
    %cst_8 = arith.constant -1.800000e+00 : f32
    %14 = vector.broadcast %cst_8 : f32 to vector<1x4xf32>
    %15 = arith.cmpf olt, %3, %14 : vector<1x4xf32>
    %16 = arith.andi %13, %15 : vector<1x4xi1>
    %17 = arith.extui %16 : vector<1x4xi1> to vector<1x4xi32>
    %18 = arith.sitofp %17 : vector<1x4xi32> to vector<1x4xf32>
    %cst_9 = arith.constant -1.800000e+00 : f32
    %19 = vector.broadcast %cst_9 : f32 to vector<1x4xf32>
    %20 = arith.cmpf oge, %3, %19 : vector<1x4xf32>
    %cst_10 = arith.constant -1.400000e+00 : f32
    %21 = vector.broadcast %cst_10 : f32 to vector<1x4xf32>
    %22 = arith.cmpf olt, %3, %21 : vector<1x4xf32>
    %23 = arith.andi %20, %22 : vector<1x4xi1>
    %24 = arith.extui %23 : vector<1x4xi1> to vector<1x4xi32>
    %25 = arith.sitofp %24 : vector<1x4xi32> to vector<1x4xf32>
    %cst_11 = arith.constant -1.400000e+00 : f32
    %26 = vector.broadcast %cst_11 : f32 to vector<1x4xf32>
    %27 = arith.cmpf oge, %3, %26 : vector<1x4xf32>
    %cst_12 = arith.constant -1.000000e+00 : f32
    %28 = vector.broadcast %cst_12 : f32 to vector<1x4xf32>
    %29 = arith.cmpf olt, %3, %28 : vector<1x4xf32>
    %30 = arith.andi %27, %29 : vector<1x4xi1>
    %31 = arith.extui %30 : vector<1x4xi1> to vector<1x4xi32>
    %32 = arith.sitofp %31 : vector<1x4xi32> to vector<1x4xf32>
    %cst_13 = arith.constant -1.000000e+00 : f32
    %33 = vector.broadcast %cst_13 : f32 to vector<1x4xf32>
    %34 = arith.cmpf oge, %3, %33 : vector<1x4xf32>
    %cst_14 = arith.constant -6.000000e-01 : f32
    %35 = vector.broadcast %cst_14 : f32 to vector<1x4xf32>
    %36 = arith.cmpf olt, %3, %35 : vector<1x4xf32>
    %37 = arith.andi %34, %36 : vector<1x4xi1>
    %38 = arith.extui %37 : vector<1x4xi1> to vector<1x4xi32>
    %39 = arith.sitofp %38 : vector<1x4xi32> to vector<1x4xf32>
    %cst_15 = arith.constant -6.000000e-01 : f32
    %40 = vector.broadcast %cst_15 : f32 to vector<1x4xf32>
    %41 = arith.cmpf oge, %3, %40 : vector<1x4xf32>
    %cst_16 = arith.constant -2.000000e-01 : f32
    %42 = vector.broadcast %cst_16 : f32 to vector<1x4xf32>
    %43 = arith.cmpf olt, %3, %42 : vector<1x4xf32>
    %44 = arith.andi %41, %43 : vector<1x4xi1>
    %45 = arith.extui %44 : vector<1x4xi1> to vector<1x4xi32>
    %46 = arith.sitofp %45 : vector<1x4xi32> to vector<1x4xf32>
    %cst_17 = arith.constant -2.000000e-01 : f32
    %47 = vector.broadcast %cst_17 : f32 to vector<1x4xf32>
    %48 = arith.cmpf oge, %3, %47 : vector<1x4xf32>
    %cst_18 = arith.constant 2.000000e-01 : f32
    %49 = vector.broadcast %cst_18 : f32 to vector<1x4xf32>
    %50 = arith.cmpf olt, %3, %49 : vector<1x4xf32>
    %51 = arith.andi %48, %50 : vector<1x4xi1>
    %52 = arith.extui %51 : vector<1x4xi1> to vector<1x4xi32>
    %53 = arith.sitofp %52 : vector<1x4xi32> to vector<1x4xf32>
    %cst_19 = arith.constant 2.000000e-01 : f32
    %54 = vector.broadcast %cst_19 : f32 to vector<1x4xf32>
    %55 = arith.cmpf oge, %3, %54 : vector<1x4xf32>
    %cst_20 = arith.constant 6.000000e-01 : f32
    %56 = vector.broadcast %cst_20 : f32 to vector<1x4xf32>
    %57 = arith.cmpf olt, %3, %56 : vector<1x4xf32>
    %58 = arith.andi %55, %57 : vector<1x4xi1>
    %59 = arith.extui %58 : vector<1x4xi1> to vector<1x4xi32>
    %60 = arith.sitofp %59 : vector<1x4xi32> to vector<1x4xf32>
    %cst_21 = arith.constant 6.000000e-01 : f32
    %61 = vector.broadcast %cst_21 : f32 to vector<1x4xf32>
    %62 = arith.cmpf oge, %3, %61 : vector<1x4xf32>
    %cst_22 = arith.constant 1.000000e+00 : f32
    %63 = vector.broadcast %cst_22 : f32 to vector<1x4xf32>
    %64 = arith.cmpf olt, %3, %63 : vector<1x4xf32>
    %65 = arith.andi %62, %64 : vector<1x4xi1>
    %66 = arith.extui %65 : vector<1x4xi1> to vector<1x4xi32>
    %67 = arith.sitofp %66 : vector<1x4xi32> to vector<1x4xf32>
    %cst_23 = arith.constant 1.000000e+00 : f32
    %68 = vector.broadcast %cst_23 : f32 to vector<1x4xf32>
    %69 = arith.cmpf oge, %3, %68 : vector<1x4xf32>
    %cst_24 = arith.constant 1.400000e+00 : f32
    %70 = vector.broadcast %cst_24 : f32 to vector<1x4xf32>
    %71 = arith.cmpf olt, %3, %70 : vector<1x4xf32>
    %72 = arith.andi %69, %71 : vector<1x4xi1>
    %73 = arith.extui %72 : vector<1x4xi1> to vector<1x4xi32>
    %74 = arith.sitofp %73 : vector<1x4xi32> to vector<1x4xf32>
    %cst_25 = arith.constant 1.400000e+00 : f32
    %75 = vector.broadcast %cst_25 : f32 to vector<1x4xf32>
    %76 = arith.cmpf oge, %3, %75 : vector<1x4xf32>
    %cst_26 = arith.constant 1.800000e+00 : f32
    %77 = vector.broadcast %cst_26 : f32 to vector<1x4xf32>
    %78 = arith.cmpf olt, %3, %77 : vector<1x4xf32>
    %79 = arith.andi %76, %78 : vector<1x4xi1>
    %80 = arith.extui %79 : vector<1x4xi1> to vector<1x4xi32>
    %81 = arith.sitofp %80 : vector<1x4xi32> to vector<1x4xf32>
    %cst_27 = arith.constant 1.800000e+00 : f32
    %82 = vector.broadcast %cst_27 : f32 to vector<1x4xf32>
    %83 = arith.cmpf oge, %3, %82 : vector<1x4xf32>
    %cst_28 = arith.constant 2.200000e+00 : f32
    %84 = vector.broadcast %cst_28 : f32 to vector<1x4xf32>
    %85 = arith.cmpf olt, %3, %84 : vector<1x4xf32>
    %86 = arith.andi %83, %85 : vector<1x4xi1>
    %87 = arith.extui %86 : vector<1x4xi1> to vector<1x4xi32>
    %88 = arith.sitofp %87 : vector<1x4xi32> to vector<1x4xf32>
    %cst_29 = arith.constant -2.200000e+00 : f32
    %89 = vector.broadcast %cst_29 : f32 to vector<1x4xf32>
    %90 = arith.subf %3, %89 : vector<1x4xf32>
    %cst_30 = arith.constant 2.500000e+00 : f32
    %91 = vector.broadcast %cst_30 : f32 to vector<1x4xf32>
    %92 = arith.mulf %90, %91 : vector<1x4xf32>
    %93 = arith.mulf %92, %18 : vector<1x4xf32>
    %cst_31 = arith.constant -1.400000e+00 : f32
    %94 = vector.broadcast %cst_31 : f32 to vector<1x4xf32>
    %95 = arith.subf %94, %3 : vector<1x4xf32>
    %cst_32 = arith.constant 2.500000e+00 : f32
    %96 = vector.broadcast %cst_32 : f32 to vector<1x4xf32>
    %97 = arith.mulf %95, %96 : vector<1x4xf32>
    %98 = arith.mulf %97, %25 : vector<1x4xf32>
    %99 = arith.addf %93, %98 : vector<1x4xf32>
    %cst_33 = arith.constant -1.800000e+00 : f32
    %100 = vector.broadcast %cst_33 : f32 to vector<1x4xf32>
    %101 = arith.subf %3, %100 : vector<1x4xf32>
    %cst_34 = arith.constant 2.500000e+00 : f32
    %102 = vector.broadcast %cst_34 : f32 to vector<1x4xf32>
    %103 = arith.mulf %101, %102 : vector<1x4xf32>
    %104 = arith.mulf %103, %25 : vector<1x4xf32>
    %cst_35 = arith.constant -1.000000e+00 : f32
    %105 = vector.broadcast %cst_35 : f32 to vector<1x4xf32>
    %106 = arith.subf %105, %3 : vector<1x4xf32>
    %cst_36 = arith.constant 2.500000e+00 : f32
    %107 = vector.broadcast %cst_36 : f32 to vector<1x4xf32>
    %108 = arith.mulf %106, %107 : vector<1x4xf32>
    %109 = arith.mulf %108, %32 : vector<1x4xf32>
    %110 = arith.addf %104, %109 : vector<1x4xf32>
    %cst_37 = arith.constant -1.400000e+00 : f32
    %111 = vector.broadcast %cst_37 : f32 to vector<1x4xf32>
    %112 = arith.subf %3, %111 : vector<1x4xf32>
    %cst_38 = arith.constant 2.500000e+00 : f32
    %113 = vector.broadcast %cst_38 : f32 to vector<1x4xf32>
    %114 = arith.mulf %112, %113 : vector<1x4xf32>
    %115 = arith.mulf %114, %32 : vector<1x4xf32>
    %cst_39 = arith.constant -6.000000e-01 : f32
    %116 = vector.broadcast %cst_39 : f32 to vector<1x4xf32>
    %117 = arith.subf %116, %3 : vector<1x4xf32>
    %cst_40 = arith.constant 2.500000e+00 : f32
    %118 = vector.broadcast %cst_40 : f32 to vector<1x4xf32>
    %119 = arith.mulf %117, %118 : vector<1x4xf32>
    %120 = arith.mulf %119, %39 : vector<1x4xf32>
    %121 = arith.addf %115, %120 : vector<1x4xf32>
    %cst_41 = arith.constant -1.000000e+00 : f32
    %122 = vector.broadcast %cst_41 : f32 to vector<1x4xf32>
    %123 = arith.subf %3, %122 : vector<1x4xf32>
    %cst_42 = arith.constant 2.500000e+00 : f32
    %124 = vector.broadcast %cst_42 : f32 to vector<1x4xf32>
    %125 = arith.mulf %123, %124 : vector<1x4xf32>
    %126 = arith.mulf %125, %39 : vector<1x4xf32>
    %cst_43 = arith.constant -2.000000e-01 : f32
    %127 = vector.broadcast %cst_43 : f32 to vector<1x4xf32>
    %128 = arith.subf %127, %3 : vector<1x4xf32>
    %cst_44 = arith.constant 2.500000e+00 : f32
    %129 = vector.broadcast %cst_44 : f32 to vector<1x4xf32>
    %130 = arith.mulf %128, %129 : vector<1x4xf32>
    %131 = arith.mulf %130, %46 : vector<1x4xf32>
    %132 = arith.addf %126, %131 : vector<1x4xf32>
    %cst_45 = arith.constant -6.000000e-01 : f32
    %133 = vector.broadcast %cst_45 : f32 to vector<1x4xf32>
    %134 = arith.subf %3, %133 : vector<1x4xf32>
    %cst_46 = arith.constant 2.500000e+00 : f32
    %135 = vector.broadcast %cst_46 : f32 to vector<1x4xf32>
    %136 = arith.mulf %134, %135 : vector<1x4xf32>
    %137 = arith.mulf %136, %46 : vector<1x4xf32>
    %cst_47 = arith.constant 2.000000e-01 : f32
    %138 = vector.broadcast %cst_47 : f32 to vector<1x4xf32>
    %139 = arith.subf %138, %3 : vector<1x4xf32>
    %cst_48 = arith.constant 2.500000e+00 : f32
    %140 = vector.broadcast %cst_48 : f32 to vector<1x4xf32>
    %141 = arith.mulf %139, %140 : vector<1x4xf32>
    %142 = arith.mulf %141, %53 : vector<1x4xf32>
    %143 = arith.addf %137, %142 : vector<1x4xf32>
    %cst_49 = arith.constant -2.000000e-01 : f32
    %144 = vector.broadcast %cst_49 : f32 to vector<1x4xf32>
    %145 = arith.subf %3, %144 : vector<1x4xf32>
    %cst_50 = arith.constant 2.500000e+00 : f32
    %146 = vector.broadcast %cst_50 : f32 to vector<1x4xf32>
    %147 = arith.mulf %145, %146 : vector<1x4xf32>
    %148 = arith.mulf %147, %53 : vector<1x4xf32>
    %cst_51 = arith.constant 6.000000e-01 : f32
    %149 = vector.broadcast %cst_51 : f32 to vector<1x4xf32>
    %150 = arith.subf %149, %3 : vector<1x4xf32>
    %cst_52 = arith.constant 2.500000e+00 : f32
    %151 = vector.broadcast %cst_52 : f32 to vector<1x4xf32>
    %152 = arith.mulf %150, %151 : vector<1x4xf32>
    %153 = arith.mulf %152, %60 : vector<1x4xf32>
    %154 = arith.addf %148, %153 : vector<1x4xf32>
    %cst_53 = arith.constant 2.000000e-01 : f32
    %155 = vector.broadcast %cst_53 : f32 to vector<1x4xf32>
    %156 = arith.subf %3, %155 : vector<1x4xf32>
    %cst_54 = arith.constant 2.500000e+00 : f32
    %157 = vector.broadcast %cst_54 : f32 to vector<1x4xf32>
    %158 = arith.mulf %156, %157 : vector<1x4xf32>
    %159 = arith.mulf %158, %60 : vector<1x4xf32>
    %cst_55 = arith.constant 1.000000e+00 : f32
    %160 = vector.broadcast %cst_55 : f32 to vector<1x4xf32>
    %161 = arith.subf %160, %3 : vector<1x4xf32>
    %cst_56 = arith.constant 2.500000e+00 : f32
    %162 = vector.broadcast %cst_56 : f32 to vector<1x4xf32>
    %163 = arith.mulf %161, %162 : vector<1x4xf32>
    %164 = arith.mulf %163, %67 : vector<1x4xf32>
    %165 = arith.addf %159, %164 : vector<1x4xf32>
    %cst_57 = arith.constant 6.000000e-01 : f32
    %166 = vector.broadcast %cst_57 : f32 to vector<1x4xf32>
    %167 = arith.subf %3, %166 : vector<1x4xf32>
    %cst_58 = arith.constant 2.500000e+00 : f32
    %168 = vector.broadcast %cst_58 : f32 to vector<1x4xf32>
    %169 = arith.mulf %167, %168 : vector<1x4xf32>
    %170 = arith.mulf %169, %67 : vector<1x4xf32>
    %cst_59 = arith.constant 1.400000e+00 : f32
    %171 = vector.broadcast %cst_59 : f32 to vector<1x4xf32>
    %172 = arith.subf %171, %3 : vector<1x4xf32>
    %cst_60 = arith.constant 2.500000e+00 : f32
    %173 = vector.broadcast %cst_60 : f32 to vector<1x4xf32>
    %174 = arith.mulf %172, %173 : vector<1x4xf32>
    %175 = arith.mulf %174, %74 : vector<1x4xf32>
    %176 = arith.addf %170, %175 : vector<1x4xf32>
    %cst_61 = arith.constant 1.000000e+00 : f32
    %177 = vector.broadcast %cst_61 : f32 to vector<1x4xf32>
    %178 = arith.subf %3, %177 : vector<1x4xf32>
    %cst_62 = arith.constant 2.500000e+00 : f32
    %179 = vector.broadcast %cst_62 : f32 to vector<1x4xf32>
    %180 = arith.mulf %178, %179 : vector<1x4xf32>
    %181 = arith.mulf %180, %74 : vector<1x4xf32>
    %cst_63 = arith.constant 1.800000e+00 : f32
    %182 = vector.broadcast %cst_63 : f32 to vector<1x4xf32>
    %183 = arith.subf %182, %3 : vector<1x4xf32>
    %cst_64 = arith.constant 2.500000e+00 : f32
    %184 = vector.broadcast %cst_64 : f32 to vector<1x4xf32>
    %185 = arith.mulf %183, %184 : vector<1x4xf32>
    %186 = arith.mulf %185, %81 : vector<1x4xf32>
    %187 = arith.addf %181, %186 : vector<1x4xf32>
    %cst_65 = arith.constant 1.400000e+00 : f32
    %188 = vector.broadcast %cst_65 : f32 to vector<1x4xf32>
    %189 = arith.subf %3, %188 : vector<1x4xf32>
    %cst_66 = arith.constant 2.500000e+00 : f32
    %190 = vector.broadcast %cst_66 : f32 to vector<1x4xf32>
    %191 = arith.mulf %189, %190 : vector<1x4xf32>
    %192 = arith.mulf %191, %81 : vector<1x4xf32>
    %cst_67 = arith.constant 2.200000e+00 : f32
    %193 = vector.broadcast %cst_67 : f32 to vector<1x4xf32>
    %194 = arith.subf %193, %3 : vector<1x4xf32>
    %cst_68 = arith.constant 2.500000e+00 : f32
    %195 = vector.broadcast %cst_68 : f32 to vector<1x4xf32>
    %196 = arith.mulf %194, %195 : vector<1x4xf32>
    %197 = arith.mulf %196, %88 : vector<1x4xf32>
    %198 = arith.addf %192, %197 : vector<1x4xf32>
    %cst_69 = arith.constant -2.200000e+00 : f32
    %199 = vector.broadcast %cst_69 : f32 to vector<1x4xf32>
    %200 = arith.subf %3, %199 : vector<1x4xf32>
    %cst_70 = arith.constant 1.250000e+00 : f32
    %201 = vector.broadcast %cst_70 : f32 to vector<1x4xf32>
    %202 = arith.mulf %200, %201 : vector<1x4xf32>
    %203 = arith.mulf %202, %99 : vector<1x4xf32>
    %cst_71 = arith.constant -1.000000e+00 : f32
    %204 = vector.broadcast %cst_71 : f32 to vector<1x4xf32>
    %205 = arith.subf %204, %3 : vector<1x4xf32>
    %cst_72 = arith.constant 1.250000e+00 : f32
    %206 = vector.broadcast %cst_72 : f32 to vector<1x4xf32>
    %207 = arith.mulf %205, %206 : vector<1x4xf32>
    %208 = arith.mulf %207, %110 : vector<1x4xf32>
    %209 = arith.addf %203, %208 : vector<1x4xf32>
    %cst_73 = arith.constant -1.800000e+00 : f32
    %210 = vector.broadcast %cst_73 : f32 to vector<1x4xf32>
    %211 = arith.subf %3, %210 : vector<1x4xf32>
    %cst_74 = arith.constant 1.250000e+00 : f32
    %212 = vector.broadcast %cst_74 : f32 to vector<1x4xf32>
    %213 = arith.mulf %211, %212 : vector<1x4xf32>
    %214 = arith.mulf %213, %110 : vector<1x4xf32>
    %cst_75 = arith.constant -6.000000e-01 : f32
    %215 = vector.broadcast %cst_75 : f32 to vector<1x4xf32>
    %216 = arith.subf %215, %3 : vector<1x4xf32>
    %cst_76 = arith.constant 1.250000e+00 : f32
    %217 = vector.broadcast %cst_76 : f32 to vector<1x4xf32>
    %218 = arith.mulf %216, %217 : vector<1x4xf32>
    %219 = arith.mulf %218, %121 : vector<1x4xf32>
    %220 = arith.addf %214, %219 : vector<1x4xf32>
    %cst_77 = arith.constant -1.400000e+00 : f32
    %221 = vector.broadcast %cst_77 : f32 to vector<1x4xf32>
    %222 = arith.subf %3, %221 : vector<1x4xf32>
    %cst_78 = arith.constant 1.250000e+00 : f32
    %223 = vector.broadcast %cst_78 : f32 to vector<1x4xf32>
    %224 = arith.mulf %222, %223 : vector<1x4xf32>
    %225 = arith.mulf %224, %121 : vector<1x4xf32>
    %cst_79 = arith.constant -2.000000e-01 : f32
    %226 = vector.broadcast %cst_79 : f32 to vector<1x4xf32>
    %227 = arith.subf %226, %3 : vector<1x4xf32>
    %cst_80 = arith.constant 1.250000e+00 : f32
    %228 = vector.broadcast %cst_80 : f32 to vector<1x4xf32>
    %229 = arith.mulf %227, %228 : vector<1x4xf32>
    %230 = arith.mulf %229, %132 : vector<1x4xf32>
    %231 = arith.addf %225, %230 : vector<1x4xf32>
    %cst_81 = arith.constant -1.000000e+00 : f32
    %232 = vector.broadcast %cst_81 : f32 to vector<1x4xf32>
    %233 = arith.subf %3, %232 : vector<1x4xf32>
    %cst_82 = arith.constant 1.250000e+00 : f32
    %234 = vector.broadcast %cst_82 : f32 to vector<1x4xf32>
    %235 = arith.mulf %233, %234 : vector<1x4xf32>
    %236 = arith.mulf %235, %132 : vector<1x4xf32>
    %cst_83 = arith.constant 2.000000e-01 : f32
    %237 = vector.broadcast %cst_83 : f32 to vector<1x4xf32>
    %238 = arith.subf %237, %3 : vector<1x4xf32>
    %cst_84 = arith.constant 1.250000e+00 : f32
    %239 = vector.broadcast %cst_84 : f32 to vector<1x4xf32>
    %240 = arith.mulf %238, %239 : vector<1x4xf32>
    %241 = arith.mulf %240, %143 : vector<1x4xf32>
    %242 = arith.addf %236, %241 : vector<1x4xf32>
    %cst_85 = arith.constant -6.000000e-01 : f32
    %243 = vector.broadcast %cst_85 : f32 to vector<1x4xf32>
    %244 = arith.subf %3, %243 : vector<1x4xf32>
    %cst_86 = arith.constant 1.250000e+00 : f32
    %245 = vector.broadcast %cst_86 : f32 to vector<1x4xf32>
    %246 = arith.mulf %244, %245 : vector<1x4xf32>
    %247 = arith.mulf %246, %143 : vector<1x4xf32>
    %cst_87 = arith.constant 6.000000e-01 : f32
    %248 = vector.broadcast %cst_87 : f32 to vector<1x4xf32>
    %249 = arith.subf %248, %3 : vector<1x4xf32>
    %cst_88 = arith.constant 1.250000e+00 : f32
    %250 = vector.broadcast %cst_88 : f32 to vector<1x4xf32>
    %251 = arith.mulf %249, %250 : vector<1x4xf32>
    %252 = arith.mulf %251, %154 : vector<1x4xf32>
    %253 = arith.addf %247, %252 : vector<1x4xf32>
    %cst_89 = arith.constant -2.000000e-01 : f32
    %254 = vector.broadcast %cst_89 : f32 to vector<1x4xf32>
    %255 = arith.subf %3, %254 : vector<1x4xf32>
    %cst_90 = arith.constant 1.250000e+00 : f32
    %256 = vector.broadcast %cst_90 : f32 to vector<1x4xf32>
    %257 = arith.mulf %255, %256 : vector<1x4xf32>
    %258 = arith.mulf %257, %154 : vector<1x4xf32>
    %cst_91 = arith.constant 1.000000e+00 : f32
    %259 = vector.broadcast %cst_91 : f32 to vector<1x4xf32>
    %260 = arith.subf %259, %3 : vector<1x4xf32>
    %cst_92 = arith.constant 1.250000e+00 : f32
    %261 = vector.broadcast %cst_92 : f32 to vector<1x4xf32>
    %262 = arith.mulf %260, %261 : vector<1x4xf32>
    %263 = arith.mulf %262, %165 : vector<1x4xf32>
    %264 = arith.addf %258, %263 : vector<1x4xf32>
    %cst_93 = arith.constant 2.000000e-01 : f32
    %265 = vector.broadcast %cst_93 : f32 to vector<1x4xf32>
    %266 = arith.subf %3, %265 : vector<1x4xf32>
    %cst_94 = arith.constant 1.250000e+00 : f32
    %267 = vector.broadcast %cst_94 : f32 to vector<1x4xf32>
    %268 = arith.mulf %266, %267 : vector<1x4xf32>
    %269 = arith.mulf %268, %165 : vector<1x4xf32>
    %cst_95 = arith.constant 1.400000e+00 : f32
    %270 = vector.broadcast %cst_95 : f32 to vector<1x4xf32>
    %271 = arith.subf %270, %3 : vector<1x4xf32>
    %cst_96 = arith.constant 1.250000e+00 : f32
    %272 = vector.broadcast %cst_96 : f32 to vector<1x4xf32>
    %273 = arith.mulf %271, %272 : vector<1x4xf32>
    %274 = arith.mulf %273, %176 : vector<1x4xf32>
    %275 = arith.addf %269, %274 : vector<1x4xf32>
    %cst_97 = arith.constant 6.000000e-01 : f32
    %276 = vector.broadcast %cst_97 : f32 to vector<1x4xf32>
    %277 = arith.subf %3, %276 : vector<1x4xf32>
    %cst_98 = arith.constant 1.250000e+00 : f32
    %278 = vector.broadcast %cst_98 : f32 to vector<1x4xf32>
    %279 = arith.mulf %277, %278 : vector<1x4xf32>
    %280 = arith.mulf %279, %176 : vector<1x4xf32>
    %cst_99 = arith.constant 1.800000e+00 : f32
    %281 = vector.broadcast %cst_99 : f32 to vector<1x4xf32>
    %282 = arith.subf %281, %3 : vector<1x4xf32>
    %cst_100 = arith.constant 1.250000e+00 : f32
    %283 = vector.broadcast %cst_100 : f32 to vector<1x4xf32>
    %284 = arith.mulf %282, %283 : vector<1x4xf32>
    %285 = arith.mulf %284, %187 : vector<1x4xf32>
    %286 = arith.addf %280, %285 : vector<1x4xf32>
    %cst_101 = arith.constant 1.000000e+00 : f32
    %287 = vector.broadcast %cst_101 : f32 to vector<1x4xf32>
    %288 = arith.subf %3, %287 : vector<1x4xf32>
    %cst_102 = arith.constant 1.250000e+00 : f32
    %289 = vector.broadcast %cst_102 : f32 to vector<1x4xf32>
    %290 = arith.mulf %288, %289 : vector<1x4xf32>
    %291 = arith.mulf %290, %187 : vector<1x4xf32>
    %cst_103 = arith.constant 2.200000e+00 : f32
    %292 = vector.broadcast %cst_103 : f32 to vector<1x4xf32>
    %293 = arith.subf %292, %3 : vector<1x4xf32>
    %cst_104 = arith.constant 1.250000e+00 : f32
    %294 = vector.broadcast %cst_104 : f32 to vector<1x4xf32>
    %295 = arith.mulf %293, %294 : vector<1x4xf32>
    %296 = arith.mulf %295, %198 : vector<1x4xf32>
    %297 = arith.addf %291, %296 : vector<1x4xf32>
    %cst_105 = arith.constant -2.200000e+00 : f32
    %298 = vector.broadcast %cst_105 : f32 to vector<1x4xf32>
    %299 = arith.subf %3, %298 : vector<1x4xf32>
    %cst_106 = arith.constant 0.833333313 : f32
    %300 = vector.broadcast %cst_106 : f32 to vector<1x4xf32>
    %301 = arith.mulf %299, %300 : vector<1x4xf32>
    %302 = arith.mulf %301, %209 : vector<1x4xf32>
    %cst_107 = arith.constant -6.000000e-01 : f32
    %303 = vector.broadcast %cst_107 : f32 to vector<1x4xf32>
    %304 = arith.subf %303, %3 : vector<1x4xf32>
    %cst_108 = arith.constant 0.833333313 : f32
    %305 = vector.broadcast %cst_108 : f32 to vector<1x4xf32>
    %306 = arith.mulf %304, %305 : vector<1x4xf32>
    %307 = arith.mulf %306, %220 : vector<1x4xf32>
    %308 = arith.addf %302, %307 : vector<1x4xf32>
    %cst_109 = arith.constant -1.800000e+00 : f32
    %309 = vector.broadcast %cst_109 : f32 to vector<1x4xf32>
    %310 = arith.subf %3, %309 : vector<1x4xf32>
    %cst_110 = arith.constant 0.833333313 : f32
    %311 = vector.broadcast %cst_110 : f32 to vector<1x4xf32>
    %312 = arith.mulf %310, %311 : vector<1x4xf32>
    %313 = arith.mulf %312, %220 : vector<1x4xf32>
    %cst_111 = arith.constant -2.000000e-01 : f32
    %314 = vector.broadcast %cst_111 : f32 to vector<1x4xf32>
    %315 = arith.subf %314, %3 : vector<1x4xf32>
    %cst_112 = arith.constant 0.833333313 : f32
    %316 = vector.broadcast %cst_112 : f32 to vector<1x4xf32>
    %317 = arith.mulf %315, %316 : vector<1x4xf32>
    %318 = arith.mulf %317, %231 : vector<1x4xf32>
    %319 = arith.addf %313, %318 : vector<1x4xf32>
    %cst_113 = arith.constant -1.400000e+00 : f32
    %320 = vector.broadcast %cst_113 : f32 to vector<1x4xf32>
    %321 = arith.subf %3, %320 : vector<1x4xf32>
    %cst_114 = arith.constant 0.833333313 : f32
    %322 = vector.broadcast %cst_114 : f32 to vector<1x4xf32>
    %323 = arith.mulf %321, %322 : vector<1x4xf32>
    %324 = arith.mulf %323, %231 : vector<1x4xf32>
    %cst_115 = arith.constant 2.000000e-01 : f32
    %325 = vector.broadcast %cst_115 : f32 to vector<1x4xf32>
    %326 = arith.subf %325, %3 : vector<1x4xf32>
    %cst_116 = arith.constant 0.833333313 : f32
    %327 = vector.broadcast %cst_116 : f32 to vector<1x4xf32>
    %328 = arith.mulf %326, %327 : vector<1x4xf32>
    %329 = arith.mulf %328, %242 : vector<1x4xf32>
    %330 = arith.addf %324, %329 : vector<1x4xf32>
    %cst_117 = arith.constant -1.000000e+00 : f32
    %331 = vector.broadcast %cst_117 : f32 to vector<1x4xf32>
    %332 = arith.subf %3, %331 : vector<1x4xf32>
    %cst_118 = arith.constant 0.833333313 : f32
    %333 = vector.broadcast %cst_118 : f32 to vector<1x4xf32>
    %334 = arith.mulf %332, %333 : vector<1x4xf32>
    %335 = arith.mulf %334, %242 : vector<1x4xf32>
    %cst_119 = arith.constant 6.000000e-01 : f32
    %336 = vector.broadcast %cst_119 : f32 to vector<1x4xf32>
    %337 = arith.subf %336, %3 : vector<1x4xf32>
    %cst_120 = arith.constant 0.833333313 : f32
    %338 = vector.broadcast %cst_120 : f32 to vector<1x4xf32>
    %339 = arith.mulf %337, %338 : vector<1x4xf32>
    %340 = arith.mulf %339, %253 : vector<1x4xf32>
    %341 = arith.addf %335, %340 : vector<1x4xf32>
    %cst_121 = arith.constant -6.000000e-01 : f32
    %342 = vector.broadcast %cst_121 : f32 to vector<1x4xf32>
    %343 = arith.subf %3, %342 : vector<1x4xf32>
    %cst_122 = arith.constant 0.833333313 : f32
    %344 = vector.broadcast %cst_122 : f32 to vector<1x4xf32>
    %345 = arith.mulf %343, %344 : vector<1x4xf32>
    %346 = arith.mulf %345, %253 : vector<1x4xf32>
    %cst_123 = arith.constant 1.000000e+00 : f32
    %347 = vector.broadcast %cst_123 : f32 to vector<1x4xf32>
    %348 = arith.subf %347, %3 : vector<1x4xf32>
    %cst_124 = arith.constant 0.833333313 : f32
    %349 = vector.broadcast %cst_124 : f32 to vector<1x4xf32>
    %350 = arith.mulf %348, %349 : vector<1x4xf32>
    %351 = arith.mulf %350, %264 : vector<1x4xf32>
    %352 = arith.addf %346, %351 : vector<1x4xf32>
    %cst_125 = arith.constant -2.000000e-01 : f32
    %353 = vector.broadcast %cst_125 : f32 to vector<1x4xf32>
    %354 = arith.subf %3, %353 : vector<1x4xf32>
    %cst_126 = arith.constant 0.833333313 : f32
    %355 = vector.broadcast %cst_126 : f32 to vector<1x4xf32>
    %356 = arith.mulf %354, %355 : vector<1x4xf32>
    %357 = arith.mulf %356, %264 : vector<1x4xf32>
    %cst_127 = arith.constant 1.400000e+00 : f32
    %358 = vector.broadcast %cst_127 : f32 to vector<1x4xf32>
    %359 = arith.subf %358, %3 : vector<1x4xf32>
    %cst_128 = arith.constant 0.833333313 : f32
    %360 = vector.broadcast %cst_128 : f32 to vector<1x4xf32>
    %361 = arith.mulf %359, %360 : vector<1x4xf32>
    %362 = arith.mulf %361, %275 : vector<1x4xf32>
    %363 = arith.addf %357, %362 : vector<1x4xf32>
    %cst_129 = arith.constant 2.000000e-01 : f32
    %364 = vector.broadcast %cst_129 : f32 to vector<1x4xf32>
    %365 = arith.subf %3, %364 : vector<1x4xf32>
    %cst_130 = arith.constant 0.833333313 : f32
    %366 = vector.broadcast %cst_130 : f32 to vector<1x4xf32>
    %367 = arith.mulf %365, %366 : vector<1x4xf32>
    %368 = arith.mulf %367, %275 : vector<1x4xf32>
    %cst_131 = arith.constant 1.800000e+00 : f32
    %369 = vector.broadcast %cst_131 : f32 to vector<1x4xf32>
    %370 = arith.subf %369, %3 : vector<1x4xf32>
    %cst_132 = arith.constant 0.833333313 : f32
    %371 = vector.broadcast %cst_132 : f32 to vector<1x4xf32>
    %372 = arith.mulf %370, %371 : vector<1x4xf32>
    %373 = arith.mulf %372, %286 : vector<1x4xf32>
    %374 = arith.addf %368, %373 : vector<1x4xf32>
    %cst_133 = arith.constant 6.000000e-01 : f32
    %375 = vector.broadcast %cst_133 : f32 to vector<1x4xf32>
    %376 = arith.subf %3, %375 : vector<1x4xf32>
    %cst_134 = arith.constant 0.833333313 : f32
    %377 = vector.broadcast %cst_134 : f32 to vector<1x4xf32>
    %378 = arith.mulf %376, %377 : vector<1x4xf32>
    %379 = arith.mulf %378, %286 : vector<1x4xf32>
    %cst_135 = arith.constant 2.200000e+00 : f32
    %380 = vector.broadcast %cst_135 : f32 to vector<1x4xf32>
    %381 = arith.subf %380, %3 : vector<1x4xf32>
    %cst_136 = arith.constant 0.833333313 : f32
    %382 = vector.broadcast %cst_136 : f32 to vector<1x4xf32>
    %383 = arith.mulf %381, %382 : vector<1x4xf32>
    %384 = arith.mulf %383, %297 : vector<1x4xf32>
    %385 = arith.addf %379, %384 : vector<1x4xf32>
    %c0_137 = arith.constant 0 : index
    %c0_138 = arith.constant 0 : index
    %386 = vector.load %arg7[%c0_137, %c0_138] : memref<1x32xf32, #tpu.memory_space<vmem>>, vector<1x4xf32>
    tpu.vector_store %arg7[%c0_137, %c0_138], %308 {strides = array<i32>} : memref<1x32xf32, #tpu.memory_space<vmem>>, vector<1x4xf32>,
    %c0_139 = arith.constant 0 : index
    %c4 = arith.constant 4 : index
    %387 = vector.load %arg7[%c0_139, %c4] : memref<1x32xf32, #tpu.memory_space<vmem>>, vector<1x4xf32>
    tpu.vector_store %arg7[%c0_139, %c4], %319 {strides = array<i32>} : memref<1x32xf32, #tpu.memory_space<vmem>>, vector<1x4xf32>,
    %c0_140 = arith.constant 0 : index
    %c8 = arith.constant 8 : index
    %388 = vector.load %arg7[%c0_140, %c8] : memref<1x32xf32, #tpu.memory_space<vmem>>, vector<1x4xf32>
    tpu.vector_store %arg7[%c0_140, %c8], %330 {strides = array<i32>} : memref<1x32xf32, #tpu.memory_space<vmem>>, vector<1x4xf32>,
    %c0_141 = arith.constant 0 : index
    %c12 = arith.constant 12 : index
    %389 = vector.load %arg7[%c0_141, %c12] : memref<1x32xf32, #tpu.memory_space<vmem>>, vector<1x4xf32>
    tpu.vector_store %arg7[%c0_141, %c12], %341 {strides = array<i32>} : memref<1x32xf32, #tpu.memory_space<vmem>>, vector<1x4xf32>,
    %c0_142 = arith.constant 0 : index
    %c16 = arith.constant 16 : index
    %390 = vector.load %arg7[%c0_142, %c16] : memref<1x32xf32, #tpu.memory_space<vmem>>, vector<1x4xf32>
    tpu.vector_store %arg7[%c0_142, %c16], %352 {strides = array<i32>} : memref<1x32xf32, #tpu.memory_space<vmem>>, vector<1x4xf32>,
    %c0_143 = arith.constant 0 : index
    %c20 = arith.constant 20 : index
    %391 = vector.load %arg7[%c0_143, %c20] : memref<1x32xf32, #tpu.memory_space<vmem>>, vector<1x4xf32>
    tpu.vector_store %arg7[%c0_143, %c20], %363 {strides = array<i32>} : memref<1x32xf32, #tpu.memory_space<vmem>>, vector<1x4xf32>,
    %c0_144 = arith.constant 0 : index
    %c24 = arith.constant 24 : index
    %392 = vector.load %arg7[%c0_144, %c24] : memref<1x32xf32, #tpu.memory_space<vmem>>, vector<1x4xf32>
    tpu.vector_store %arg7[%c0_144, %c24], %374 {strides = array<i32>} : memref<1x32xf32, #tpu.memory_space<vmem>>, vector<1x4xf32>,
    %c0_145 = arith.constant 0 : index
    %c28 = arith.constant 28 : index
    %393 = vector.load %arg7[%c0_145, %c28] : memref<1x32xf32, #tpu.memory_space<vmem>>, vector<1x4xf32>
    tpu.vector_store %arg7[%c0_145, %c28], %385 {strides = array<i32>} : memref<1x32xf32, #tpu.memory_space<vmem>>, vector<1x4xf32>,
    %c0_146 = arith.constant 0 : index
    %c0_147 = arith.constant 0 : index
    %394 = vector.load %arg7[%c0_146, %c0_147] : memref<1x32xf32, #tpu.memory_space<vmem>>, vector<1x32xf32>
    %c0_148 = arith.constant 0 : index
    %c0_149 = arith.constant 0 : index
    %395 = vector.load %arg3[%c0_148, %c0_149] : memref<32x4xf32, #tpu.memory_space<vmem>>, vector<32x4xf32>
    %cst_150 = arith.constant dense<0.000000e+00> : vector<1x4xf32>
    %396 = tpu.matmul %394, %395, %cst_150 {dimension_numbers = #tpu.dot_dimension_numbers<[1], [0], [0], [1], [0, 0, 1, 1], [], []>} : vector<1x32xf32>, vector<32x4xf32>, vector<1x4xf32> -> vector<1x4xf32>
    %397 = arith.addf %11, %396 : vector<1x4xf32>
    %398 = arith.negf %397 : vector<1x4xf32>
    %399 = math.exp %398 : vector<1x4xf32>
    %cst_151 = arith.constant 1.000000e+00 : f32
    %400 = vector.broadcast %cst_151 : f32 to vector<1x4xf32>
    %401 = arith.addf %400, %399 : vector<1x4xf32>
    %402 = arith.divf %400, %401 : vector<1x4xf32>
    %403 = arith.mulf %397, %402 : vector<1x4xf32>
    %c0_152 = arith.constant 0 : index
    %c0_153 = arith.constant 0 : index
    %404 = vector.load %arg4[%c0_152, %c0_153] : memref<4x4xf32, #tpu.memory_space<vmem>>, vector<4x4xf32>
    %cst_154 = arith.constant dense<0.000000e+00> : vector<1x4xf32>
    %405 = tpu.matmul %403, %404, %cst_154 {dimension_numbers = #tpu.dot_dimension_numbers<[1], [0], [0], [1], [0, 0, 1, 1], [], []>} : vector<1x4xf32>, vector<4x4xf32>, vector<1x4xf32> -> vector<1x4xf32>
    %cst_155 = arith.constant -2.200000e+00 : f32
    %406 = vector.broadcast %cst_155 : f32 to vector<1x4xf32>
    %407 = arith.cmpf oge, %397, %406 : vector<1x4xf32>
    %cst_156 = arith.constant -1.800000e+00 : f32
    %408 = vector.broadcast %cst_156 : f32 to vector<1x4xf32>
    %409 = arith.cmpf olt, %397, %408 : vector<1x4xf32>
    %410 = arith.andi %407, %409 : vector<1x4xi1>
    %411 = arith.extui %410 : vector<1x4xi1> to vector<1x4xi32>
    %412 = arith.sitofp %411 : vector<1x4xi32> to vector<1x4xf32>
    %cst_157 = arith.constant -1.800000e+00 : f32
    %413 = vector.broadcast %cst_157 : f32 to vector<1x4xf32>
    %414 = arith.cmpf oge, %397, %413 : vector<1x4xf32>
    %cst_158 = arith.constant -1.400000e+00 : f32
    %415 = vector.broadcast %cst_158 : f32 to vector<1x4xf32>
    %416 = arith.cmpf olt, %397, %415 : vector<1x4xf32>
    %417 = arith.andi %414, %416 : vector<1x4xi1>
    %418 = arith.extui %417 : vector<1x4xi1> to vector<1x4xi32>
    %419 = arith.sitofp %418 : vector<1x4xi32> to vector<1x4xf32>
    %cst_159 = arith.constant -1.400000e+00 : f32
    %420 = vector.broadcast %cst_159 : f32 to vector<1x4xf32>
    %421 = arith.cmpf oge, %397, %420 : vector<1x4xf32>
    %cst_160 = arith.constant -1.000000e+00 : f32
    %422 = vector.broadcast %cst_160 : f32 to vector<1x4xf32>
    %423 = arith.cmpf olt, %397, %422 : vector<1x4xf32>
    %424 = arith.andi %421, %423 : vector<1x4xi1>
    %425 = arith.extui %424 : vector<1x4xi1> to vector<1x4xi32>
    %426 = arith.sitofp %425 : vector<1x4xi32> to vector<1x4xf32>
    %cst_161 = arith.constant -1.000000e+00 : f32
    %427 = vector.broadcast %cst_161 : f32 to vector<1x4xf32>
    %428 = arith.cmpf oge, %397, %427 : vector<1x4xf32>
    %cst_162 = arith.constant -6.000000e-01 : f32
    %429 = vector.broadcast %cst_162 : f32 to vector<1x4xf32>
    %430 = arith.cmpf olt, %397, %429 : vector<1x4xf32>
    %431 = arith.andi %428, %430 : vector<1x4xi1>
    %432 = arith.extui %431 : vector<1x4xi1> to vector<1x4xi32>
    %433 = arith.sitofp %432 : vector<1x4xi32> to vector<1x4xf32>
    %cst_163 = arith.constant -6.000000e-01 : f32
    %434 = vector.broadcast %cst_163 : f32 to vector<1x4xf32>
    %435 = arith.cmpf oge, %397, %434 : vector<1x4xf32>
    %cst_164 = arith.constant -2.000000e-01 : f32
    %436 = vector.broadcast %cst_164 : f32 to vector<1x4xf32>
    %437 = arith.cmpf olt, %397, %436 : vector<1x4xf32>
    %438 = arith.andi %435, %437 : vector<1x4xi1>
    %439 = arith.extui %438 : vector<1x4xi1> to vector<1x4xi32>
    %440 = arith.sitofp %439 : vector<1x4xi32> to vector<1x4xf32>
    %cst_165 = arith.constant -2.000000e-01 : f32
    %441 = vector.broadcast %cst_165 : f32 to vector<1x4xf32>
    %442 = arith.cmpf oge, %397, %441 : vector<1x4xf32>
    %cst_166 = arith.constant 2.000000e-01 : f32
    %443 = vector.broadcast %cst_166 : f32 to vector<1x4xf32>
    %444 = arith.cmpf olt, %397, %443 : vector<1x4xf32>
    %445 = arith.andi %442, %444 : vector<1x4xi1>
    %446 = arith.extui %445 : vector<1x4xi1> to vector<1x4xi32>
    %447 = arith.sitofp %446 : vector<1x4xi32> to vector<1x4xf32>
    %cst_167 = arith.constant 2.000000e-01 : f32
    %448 = vector.broadcast %cst_167 : f32 to vector<1x4xf32>
    %449 = arith.cmpf oge, %397, %448 : vector<1x4xf32>
    %cst_168 = arith.constant 6.000000e-01 : f32
    %450 = vector.broadcast %cst_168 : f32 to vector<1x4xf32>
    %451 = arith.cmpf olt, %397, %450 : vector<1x4xf32>
    %452 = arith.andi %449, %451 : vector<1x4xi1>
    %453 = arith.extui %452 : vector<1x4xi1> to vector<1x4xi32>
    %454 = arith.sitofp %453 : vector<1x4xi32> to vector<1x4xf32>
    %cst_169 = arith.constant 6.000000e-01 : f32
    %455 = vector.broadcast %cst_169 : f32 to vector<1x4xf32>
    %456 = arith.cmpf oge, %397, %455 : vector<1x4xf32>
    %cst_170 = arith.constant 1.000000e+00 : f32
    %457 = vector.broadcast %cst_170 : f32 to vector<1x4xf32>
    %458 = arith.cmpf olt, %397, %457 : vector<1x4xf32>
    %459 = arith.andi %456, %458 : vector<1x4xi1>
    %460 = arith.extui %459 : vector<1x4xi1> to vector<1x4xi32>
    %461 = arith.sitofp %460 : vector<1x4xi32> to vector<1x4xf32>
    %cst_171 = arith.constant 1.000000e+00 : f32
    %462 = vector.broadcast %cst_171 : f32 to vector<1x4xf32>
    %463 = arith.cmpf oge, %397, %462 : vector<1x4xf32>
    %cst_172 = arith.constant 1.400000e+00 : f32
    %464 = vector.broadcast %cst_172 : f32 to vector<1x4xf32>
    %465 = arith.cmpf olt, %397, %464 : vector<1x4xf32>
    %466 = arith.andi %463, %465 : vector<1x4xi1>
    %467 = arith.extui %466 : vector<1x4xi1> to vector<1x4xi32>
    %468 = arith.sitofp %467 : vector<1x4xi32> to vector<1x4xf32>
    %cst_173 = arith.constant 1.400000e+00 : f32
    %469 = vector.broadcast %cst_173 : f32 to vector<1x4xf32>
    %470 = arith.cmpf oge, %397, %469 : vector<1x4xf32>
    %cst_174 = arith.constant 1.800000e+00 : f32
    %471 = vector.broadcast %cst_174 : f32 to vector<1x4xf32>
    %472 = arith.cmpf olt, %397, %471 : vector<1x4xf32>
    %473 = arith.andi %470, %472 : vector<1x4xi1>
    %474 = arith.extui %473 : vector<1x4xi1> to vector<1x4xi32>
    %475 = arith.sitofp %474 : vector<1x4xi32> to vector<1x4xf32>
    %cst_175 = arith.constant 1.800000e+00 : f32
    %476 = vector.broadcast %cst_175 : f32 to vector<1x4xf32>
    %477 = arith.cmpf oge, %397, %476 : vector<1x4xf32>
    %cst_176 = arith.constant 2.200000e+00 : f32
    %478 = vector.broadcast %cst_176 : f32 to vector<1x4xf32>
    %479 = arith.cmpf olt, %397, %478 : vector<1x4xf32>
    %480 = arith.andi %477, %479 : vector<1x4xi1>
    %481 = arith.extui %480 : vector<1x4xi1> to vector<1x4xi32>
    %482 = arith.sitofp %481 : vector<1x4xi32> to vector<1x4xf32>
    %cst_177 = arith.constant -2.200000e+00 : f32
    %483 = vector.broadcast %cst_177 : f32 to vector<1x4xf32>
    %484 = arith.subf %397, %483 : vector<1x4xf32>
    %cst_178 = arith.constant 2.500000e+00 : f32
    %485 = vector.broadcast %cst_178 : f32 to vector<1x4xf32>
    %486 = arith.mulf %484, %485 : vector<1x4xf32>
    %487 = arith.mulf %486, %412 : vector<1x4xf32>
    %cst_179 = arith.constant -1.400000e+00 : f32
    %488 = vector.broadcast %cst_179 : f32 to vector<1x4xf32>
    %489 = arith.subf %488, %397 : vector<1x4xf32>
    %cst_180 = arith.constant 2.500000e+00 : f32
    %490 = vector.broadcast %cst_180 : f32 to vector<1x4xf32>
    %491 = arith.mulf %489, %490 : vector<1x4xf32>
    %492 = arith.mulf %491, %419 : vector<1x4xf32>
    %493 = arith.addf %487, %492 : vector<1x4xf32>
    %cst_181 = arith.constant -1.800000e+00 : f32
    %494 = vector.broadcast %cst_181 : f32 to vector<1x4xf32>
    %495 = arith.subf %397, %494 : vector<1x4xf32>
    %cst_182 = arith.constant 2.500000e+00 : f32
    %496 = vector.broadcast %cst_182 : f32 to vector<1x4xf32>
    %497 = arith.mulf %495, %496 : vector<1x4xf32>
    %498 = arith.mulf %497, %419 : vector<1x4xf32>
    %cst_183 = arith.constant -1.000000e+00 : f32
    %499 = vector.broadcast %cst_183 : f32 to vector<1x4xf32>
    %500 = arith.subf %499, %397 : vector<1x4xf32>
    %cst_184 = arith.constant 2.500000e+00 : f32
    %501 = vector.broadcast %cst_184 : f32 to vector<1x4xf32>
    %502 = arith.mulf %500, %501 : vector<1x4xf32>
    %503 = arith.mulf %502, %426 : vector<1x4xf32>
    %504 = arith.addf %498, %503 : vector<1x4xf32>
    %cst_185 = arith.constant -1.400000e+00 : f32
    %505 = vector.broadcast %cst_185 : f32 to vector<1x4xf32>
    %506 = arith.subf %397, %505 : vector<1x4xf32>
    %cst_186 = arith.constant 2.500000e+00 : f32
    %507 = vector.broadcast %cst_186 : f32 to vector<1x4xf32>
    %508 = arith.mulf %506, %507 : vector<1x4xf32>
    %509 = arith.mulf %508, %426 : vector<1x4xf32>
    %cst_187 = arith.constant -6.000000e-01 : f32
    %510 = vector.broadcast %cst_187 : f32 to vector<1x4xf32>
    %511 = arith.subf %510, %397 : vector<1x4xf32>
    %cst_188 = arith.constant 2.500000e+00 : f32
    %512 = vector.broadcast %cst_188 : f32 to vector<1x4xf32>
    %513 = arith.mulf %511, %512 : vector<1x4xf32>
    %514 = arith.mulf %513, %433 : vector<1x4xf32>
    %515 = arith.addf %509, %514 : vector<1x4xf32>
    %cst_189 = arith.constant -1.000000e+00 : f32
    %516 = vector.broadcast %cst_189 : f32 to vector<1x4xf32>
    %517 = arith.subf %397, %516 : vector<1x4xf32>
    %cst_190 = arith.constant 2.500000e+00 : f32
    %518 = vector.broadcast %cst_190 : f32 to vector<1x4xf32>
    %519 = arith.mulf %517, %518 : vector<1x4xf32>
    %520 = arith.mulf %519, %433 : vector<1x4xf32>
    %cst_191 = arith.constant -2.000000e-01 : f32
    %521 = vector.broadcast %cst_191 : f32 to vector<1x4xf32>
    %522 = arith.subf %521, %397 : vector<1x4xf32>
    %cst_192 = arith.constant 2.500000e+00 : f32
    %523 = vector.broadcast %cst_192 : f32 to vector<1x4xf32>
    %524 = arith.mulf %522, %523 : vector<1x4xf32>
    %525 = arith.mulf %524, %440 : vector<1x4xf32>
    %526 = arith.addf %520, %525 : vector<1x4xf32>
    %cst_193 = arith.constant -6.000000e-01 : f32
    %527 = vector.broadcast %cst_193 : f32 to vector<1x4xf32>
    %528 = arith.subf %397, %527 : vector<1x4xf32>
    %cst_194 = arith.constant 2.500000e+00 : f32
    %529 = vector.broadcast %cst_194 : f32 to vector<1x4xf32>
    %530 = arith.mulf %528, %529 : vector<1x4xf32>
    %531 = arith.mulf %530, %440 : vector<1x4xf32>
    %cst_195 = arith.constant 2.000000e-01 : f32
    %532 = vector.broadcast %cst_195 : f32 to vector<1x4xf32>
    %533 = arith.subf %532, %397 : vector<1x4xf32>
    %cst_196 = arith.constant 2.500000e+00 : f32
    %534 = vector.broadcast %cst_196 : f32 to vector<1x4xf32>
    %535 = arith.mulf %533, %534 : vector<1x4xf32>
    %536 = arith.mulf %535, %447 : vector<1x4xf32>
    %537 = arith.addf %531, %536 : vector<1x4xf32>
    %cst_197 = arith.constant -2.000000e-01 : f32
    %538 = vector.broadcast %cst_197 : f32 to vector<1x4xf32>
    %539 = arith.subf %397, %538 : vector<1x4xf32>
    %cst_198 = arith.constant 2.500000e+00 : f32
    %540 = vector.broadcast %cst_198 : f32 to vector<1x4xf32>
    %541 = arith.mulf %539, %540 : vector<1x4xf32>
    %542 = arith.mulf %541, %447 : vector<1x4xf32>
    %cst_199 = arith.constant 6.000000e-01 : f32
    %543 = vector.broadcast %cst_199 : f32 to vector<1x4xf32>
    %544 = arith.subf %543, %397 : vector<1x4xf32>
    %cst_200 = arith.constant 2.500000e+00 : f32
    %545 = vector.broadcast %cst_200 : f32 to vector<1x4xf32>
    %546 = arith.mulf %544, %545 : vector<1x4xf32>
    %547 = arith.mulf %546, %454 : vector<1x4xf32>
    %548 = arith.addf %542, %547 : vector<1x4xf32>
    %cst_201 = arith.constant 2.000000e-01 : f32
    %549 = vector.broadcast %cst_201 : f32 to vector<1x4xf32>
    %550 = arith.subf %397, %549 : vector<1x4xf32>
    %cst_202 = arith.constant 2.500000e+00 : f32
    %551 = vector.broadcast %cst_202 : f32 to vector<1x4xf32>
    %552 = arith.mulf %550, %551 : vector<1x4xf32>
    %553 = arith.mulf %552, %454 : vector<1x4xf32>
    %cst_203 = arith.constant 1.000000e+00 : f32
    %554 = vector.broadcast %cst_203 : f32 to vector<1x4xf32>
    %555 = arith.subf %554, %397 : vector<1x4xf32>
    %cst_204 = arith.constant 2.500000e+00 : f32
    %556 = vector.broadcast %cst_204 : f32 to vector<1x4xf32>
    %557 = arith.mulf %555, %556 : vector<1x4xf32>
    %558 = arith.mulf %557, %461 : vector<1x4xf32>
    %559 = arith.addf %553, %558 : vector<1x4xf32>
    %cst_205 = arith.constant 6.000000e-01 : f32
    %560 = vector.broadcast %cst_205 : f32 to vector<1x4xf32>
    %561 = arith.subf %397, %560 : vector<1x4xf32>
    %cst_206 = arith.constant 2.500000e+00 : f32
    %562 = vector.broadcast %cst_206 : f32 to vector<1x4xf32>
    %563 = arith.mulf %561, %562 : vector<1x4xf32>
    %564 = arith.mulf %563, %461 : vector<1x4xf32>
    %cst_207 = arith.constant 1.400000e+00 : f32
    %565 = vector.broadcast %cst_207 : f32 to vector<1x4xf32>
    %566 = arith.subf %565, %397 : vector<1x4xf32>
    %cst_208 = arith.constant 2.500000e+00 : f32
    %567 = vector.broadcast %cst_208 : f32 to vector<1x4xf32>
    %568 = arith.mulf %566, %567 : vector<1x4xf32>
    %569 = arith.mulf %568, %468 : vector<1x4xf32>
    %570 = arith.addf %564, %569 : vector<1x4xf32>
    %cst_209 = arith.constant 1.000000e+00 : f32
    %571 = vector.broadcast %cst_209 : f32 to vector<1x4xf32>
    %572 = arith.subf %397, %571 : vector<1x4xf32>
    %cst_210 = arith.constant 2.500000e+00 : f32
    %573 = vector.broadcast %cst_210 : f32 to vector<1x4xf32>
    %574 = arith.mulf %572, %573 : vector<1x4xf32>
    %575 = arith.mulf %574, %468 : vector<1x4xf32>
    %cst_211 = arith.constant 1.800000e+00 : f32
    %576 = vector.broadcast %cst_211 : f32 to vector<1x4xf32>
    %577 = arith.subf %576, %397 : vector<1x4xf32>
    %cst_212 = arith.constant 2.500000e+00 : f32
    %578 = vector.broadcast %cst_212 : f32 to vector<1x4xf32>
    %579 = arith.mulf %577, %578 : vector<1x4xf32>
    %580 = arith.mulf %579, %475 : vector<1x4xf32>
    %581 = arith.addf %575, %580 : vector<1x4xf32>
    %cst_213 = arith.constant 1.400000e+00 : f32
    %582 = vector.broadcast %cst_213 : f32 to vector<1x4xf32>
    %583 = arith.subf %397, %582 : vector<1x4xf32>
    %cst_214 = arith.constant 2.500000e+00 : f32
    %584 = vector.broadcast %cst_214 : f32 to vector<1x4xf32>
    %585 = arith.mulf %583, %584 : vector<1x4xf32>
    %586 = arith.mulf %585, %475 : vector<1x4xf32>
    %cst_215 = arith.constant 2.200000e+00 : f32
    %587 = vector.broadcast %cst_215 : f32 to vector<1x4xf32>
    %588 = arith.subf %587, %397 : vector<1x4xf32>
    %cst_216 = arith.constant 2.500000e+00 : f32
    %589 = vector.broadcast %cst_216 : f32 to vector<1x4xf32>
    %590 = arith.mulf %588, %589 : vector<1x4xf32>
    %591 = arith.mulf %590, %482 : vector<1x4xf32>
    %592 = arith.addf %586, %591 : vector<1x4xf32>
    %cst_217 = arith.constant -2.200000e+00 : f32
    %593 = vector.broadcast %cst_217 : f32 to vector<1x4xf32>
    %594 = arith.subf %397, %593 : vector<1x4xf32>
    %cst_218 = arith.constant 1.250000e+00 : f32
    %595 = vector.broadcast %cst_218 : f32 to vector<1x4xf32>
    %596 = arith.mulf %594, %595 : vector<1x4xf32>
    %597 = arith.mulf %596, %493 : vector<1x4xf32>
    %cst_219 = arith.constant -1.000000e+00 : f32
    %598 = vector.broadcast %cst_219 : f32 to vector<1x4xf32>
    %599 = arith.subf %598, %397 : vector<1x4xf32>
    %cst_220 = arith.constant 1.250000e+00 : f32
    %600 = vector.broadcast %cst_220 : f32 to vector<1x4xf32>
    %601 = arith.mulf %599, %600 : vector<1x4xf32>
    %602 = arith.mulf %601, %504 : vector<1x4xf32>
    %603 = arith.addf %597, %602 : vector<1x4xf32>
    %cst_221 = arith.constant -1.800000e+00 : f32
    %604 = vector.broadcast %cst_221 : f32 to vector<1x4xf32>
    %605 = arith.subf %397, %604 : vector<1x4xf32>
    %cst_222 = arith.constant 1.250000e+00 : f32
    %606 = vector.broadcast %cst_222 : f32 to vector<1x4xf32>
    %607 = arith.mulf %605, %606 : vector<1x4xf32>
    %608 = arith.mulf %607, %504 : vector<1x4xf32>
    %cst_223 = arith.constant -6.000000e-01 : f32
    %609 = vector.broadcast %cst_223 : f32 to vector<1x4xf32>
    %610 = arith.subf %609, %397 : vector<1x4xf32>
    %cst_224 = arith.constant 1.250000e+00 : f32
    %611 = vector.broadcast %cst_224 : f32 to vector<1x4xf32>
    %612 = arith.mulf %610, %611 : vector<1x4xf32>
    %613 = arith.mulf %612, %515 : vector<1x4xf32>
    %614 = arith.addf %608, %613 : vector<1x4xf32>
    %cst_225 = arith.constant -1.400000e+00 : f32
    %615 = vector.broadcast %cst_225 : f32 to vector<1x4xf32>
    %616 = arith.subf %397, %615 : vector<1x4xf32>
    %cst_226 = arith.constant 1.250000e+00 : f32
    %617 = vector.broadcast %cst_226 : f32 to vector<1x4xf32>
    %618 = arith.mulf %616, %617 : vector<1x4xf32>
    %619 = arith.mulf %618, %515 : vector<1x4xf32>
    %cst_227 = arith.constant -2.000000e-01 : f32
    %620 = vector.broadcast %cst_227 : f32 to vector<1x4xf32>
    %621 = arith.subf %620, %397 : vector<1x4xf32>
    %cst_228 = arith.constant 1.250000e+00 : f32
    %622 = vector.broadcast %cst_228 : f32 to vector<1x4xf32>
    %623 = arith.mulf %621, %622 : vector<1x4xf32>
    %624 = arith.mulf %623, %526 : vector<1x4xf32>
    %625 = arith.addf %619, %624 : vector<1x4xf32>
    %cst_229 = arith.constant -1.000000e+00 : f32
    %626 = vector.broadcast %cst_229 : f32 to vector<1x4xf32>
    %627 = arith.subf %397, %626 : vector<1x4xf32>
    %cst_230 = arith.constant 1.250000e+00 : f32
    %628 = vector.broadcast %cst_230 : f32 to vector<1x4xf32>
    %629 = arith.mulf %627, %628 : vector<1x4xf32>
    %630 = arith.mulf %629, %526 : vector<1x4xf32>
    %cst_231 = arith.constant 2.000000e-01 : f32
    %631 = vector.broadcast %cst_231 : f32 to vector<1x4xf32>
    %632 = arith.subf %631, %397 : vector<1x4xf32>
    %cst_232 = arith.constant 1.250000e+00 : f32
    %633 = vector.broadcast %cst_232 : f32 to vector<1x4xf32>
    %634 = arith.mulf %632, %633 : vector<1x4xf32>
    %635 = arith.mulf %634, %537 : vector<1x4xf32>
    %636 = arith.addf %630, %635 : vector<1x4xf32>
    %cst_233 = arith.constant -6.000000e-01 : f32
    %637 = vector.broadcast %cst_233 : f32 to vector<1x4xf32>
    %638 = arith.subf %397, %637 : vector<1x4xf32>
    %cst_234 = arith.constant 1.250000e+00 : f32
    %639 = vector.broadcast %cst_234 : f32 to vector<1x4xf32>
    %640 = arith.mulf %638, %639 : vector<1x4xf32>
    %641 = arith.mulf %640, %537 : vector<1x4xf32>
    %cst_235 = arith.constant 6.000000e-01 : f32
    %642 = vector.broadcast %cst_235 : f32 to vector<1x4xf32>
    %643 = arith.subf %642, %397 : vector<1x4xf32>
    %cst_236 = arith.constant 1.250000e+00 : f32
    %644 = vector.broadcast %cst_236 : f32 to vector<1x4xf32>
    %645 = arith.mulf %643, %644 : vector<1x4xf32>
    %646 = arith.mulf %645, %548 : vector<1x4xf32>
    %647 = arith.addf %641, %646 : vector<1x4xf32>
    %cst_237 = arith.constant -2.000000e-01 : f32
    %648 = vector.broadcast %cst_237 : f32 to vector<1x4xf32>
    %649 = arith.subf %397, %648 : vector<1x4xf32>
    %cst_238 = arith.constant 1.250000e+00 : f32
    %650 = vector.broadcast %cst_238 : f32 to vector<1x4xf32>
    %651 = arith.mulf %649, %650 : vector<1x4xf32>
    %652 = arith.mulf %651, %548 : vector<1x4xf32>
    %cst_239 = arith.constant 1.000000e+00 : f32
    %653 = vector.broadcast %cst_239 : f32 to vector<1x4xf32>
    %654 = arith.subf %653, %397 : vector<1x4xf32>
    %cst_240 = arith.constant 1.250000e+00 : f32
    %655 = vector.broadcast %cst_240 : f32 to vector<1x4xf32>
    %656 = arith.mulf %654, %655 : vector<1x4xf32>
    %657 = arith.mulf %656, %559 : vector<1x4xf32>
    %658 = arith.addf %652, %657 : vector<1x4xf32>
    %cst_241 = arith.constant 2.000000e-01 : f32
    %659 = vector.broadcast %cst_241 : f32 to vector<1x4xf32>
    %660 = arith.subf %397, %659 : vector<1x4xf32>
    %cst_242 = arith.constant 1.250000e+00 : f32
    %661 = vector.broadcast %cst_242 : f32 to vector<1x4xf32>
    %662 = arith.mulf %660, %661 : vector<1x4xf32>
    %663 = arith.mulf %662, %559 : vector<1x4xf32>
    %cst_243 = arith.constant 1.400000e+00 : f32
    %664 = vector.broadcast %cst_243 : f32 to vector<1x4xf32>
    %665 = arith.subf %664, %397 : vector<1x4xf32>
    %cst_244 = arith.constant 1.250000e+00 : f32
    %666 = vector.broadcast %cst_244 : f32 to vector<1x4xf32>
    %667 = arith.mulf %665, %666 : vector<1x4xf32>
    %668 = arith.mulf %667, %570 : vector<1x4xf32>
    %669 = arith.addf %663, %668 : vector<1x4xf32>
    %cst_245 = arith.constant 6.000000e-01 : f32
    %670 = vector.broadcast %cst_245 : f32 to vector<1x4xf32>
    %671 = arith.subf %397, %670 : vector<1x4xf32>
    %cst_246 = arith.constant 1.250000e+00 : f32
    %672 = vector.broadcast %cst_246 : f32 to vector<1x4xf32>
    %673 = arith.mulf %671, %672 : vector<1x4xf32>
    %674 = arith.mulf %673, %570 : vector<1x4xf32>
    %cst_247 = arith.constant 1.800000e+00 : f32
    %675 = vector.broadcast %cst_247 : f32 to vector<1x4xf32>
    %676 = arith.subf %675, %397 : vector<1x4xf32>
    %cst_248 = arith.constant 1.250000e+00 : f32
    %677 = vector.broadcast %cst_248 : f32 to vector<1x4xf32>
    %678 = arith.mulf %676, %677 : vector<1x4xf32>
    %679 = arith.mulf %678, %581 : vector<1x4xf32>
    %680 = arith.addf %674, %679 : vector<1x4xf32>
    %cst_249 = arith.constant 1.000000e+00 : f32
    %681 = vector.broadcast %cst_249 : f32 to vector<1x4xf32>
    %682 = arith.subf %397, %681 : vector<1x4xf32>
    %cst_250 = arith.constant 1.250000e+00 : f32
    %683 = vector.broadcast %cst_250 : f32 to vector<1x4xf32>
    %684 = arith.mulf %682, %683 : vector<1x4xf32>
    %685 = arith.mulf %684, %581 : vector<1x4xf32>
    %cst_251 = arith.constant 2.200000e+00 : f32
    %686 = vector.broadcast %cst_251 : f32 to vector<1x4xf32>
    %687 = arith.subf %686, %397 : vector<1x4xf32>
    %cst_252 = arith.constant 1.250000e+00 : f32
    %688 = vector.broadcast %cst_252 : f32 to vector<1x4xf32>
    %689 = arith.mulf %687, %688 : vector<1x4xf32>
    %690 = arith.mulf %689, %592 : vector<1x4xf32>
    %691 = arith.addf %685, %690 : vector<1x4xf32>
    %cst_253 = arith.constant -2.200000e+00 : f32
    %692 = vector.broadcast %cst_253 : f32 to vector<1x4xf32>
    %693 = arith.subf %397, %692 : vector<1x4xf32>
    %cst_254 = arith.constant 0.833333313 : f32
    %694 = vector.broadcast %cst_254 : f32 to vector<1x4xf32>
    %695 = arith.mulf %693, %694 : vector<1x4xf32>
    %696 = arith.mulf %695, %603 : vector<1x4xf32>
    %cst_255 = arith.constant -6.000000e-01 : f32
    %697 = vector.broadcast %cst_255 : f32 to vector<1x4xf32>
    %698 = arith.subf %697, %397 : vector<1x4xf32>
    %cst_256 = arith.constant 0.833333313 : f32
    %699 = vector.broadcast %cst_256 : f32 to vector<1x4xf32>
    %700 = arith.mulf %698, %699 : vector<1x4xf32>
    %701 = arith.mulf %700, %614 : vector<1x4xf32>
    %702 = arith.addf %696, %701 : vector<1x4xf32>
    %cst_257 = arith.constant -1.800000e+00 : f32
    %703 = vector.broadcast %cst_257 : f32 to vector<1x4xf32>
    %704 = arith.subf %397, %703 : vector<1x4xf32>
    %cst_258 = arith.constant 0.833333313 : f32
    %705 = vector.broadcast %cst_258 : f32 to vector<1x4xf32>
    %706 = arith.mulf %704, %705 : vector<1x4xf32>
    %707 = arith.mulf %706, %614 : vector<1x4xf32>
    %cst_259 = arith.constant -2.000000e-01 : f32
    %708 = vector.broadcast %cst_259 : f32 to vector<1x4xf32>
    %709 = arith.subf %708, %397 : vector<1x4xf32>
    %cst_260 = arith.constant 0.833333313 : f32
    %710 = vector.broadcast %cst_260 : f32 to vector<1x4xf32>
    %711 = arith.mulf %709, %710 : vector<1x4xf32>
    %712 = arith.mulf %711, %625 : vector<1x4xf32>
    %713 = arith.addf %707, %712 : vector<1x4xf32>
    %cst_261 = arith.constant -1.400000e+00 : f32
    %714 = vector.broadcast %cst_261 : f32 to vector<1x4xf32>
    %715 = arith.subf %397, %714 : vector<1x4xf32>
    %cst_262 = arith.constant 0.833333313 : f32
    %716 = vector.broadcast %cst_262 : f32 to vector<1x4xf32>
    %717 = arith.mulf %715, %716 : vector<1x4xf32>
    %718 = arith.mulf %717, %625 : vector<1x4xf32>
    %cst_263 = arith.constant 2.000000e-01 : f32
    %719 = vector.broadcast %cst_263 : f32 to vector<1x4xf32>
    %720 = arith.subf %719, %397 : vector<1x4xf32>
    %cst_264 = arith.constant 0.833333313 : f32
    %721 = vector.broadcast %cst_264 : f32 to vector<1x4xf32>
    %722 = arith.mulf %720, %721 : vector<1x4xf32>
    %723 = arith.mulf %722, %636 : vector<1x4xf32>
    %724 = arith.addf %718, %723 : vector<1x4xf32>
    %cst_265 = arith.constant -1.000000e+00 : f32
    %725 = vector.broadcast %cst_265 : f32 to vector<1x4xf32>
    %726 = arith.subf %397, %725 : vector<1x4xf32>
    %cst_266 = arith.constant 0.833333313 : f32
    %727 = vector.broadcast %cst_266 : f32 to vector<1x4xf32>
    %728 = arith.mulf %726, %727 : vector<1x4xf32>
    %729 = arith.mulf %728, %636 : vector<1x4xf32>
    %cst_267 = arith.constant 6.000000e-01 : f32
    %730 = vector.broadcast %cst_267 : f32 to vector<1x4xf32>
    %731 = arith.subf %730, %397 : vector<1x4xf32>
    %cst_268 = arith.constant 0.833333313 : f32
    %732 = vector.broadcast %cst_268 : f32 to vector<1x4xf32>
    %733 = arith.mulf %731, %732 : vector<1x4xf32>
    %734 = arith.mulf %733, %647 : vector<1x4xf32>
    %735 = arith.addf %729, %734 : vector<1x4xf32>
    %cst_269 = arith.constant -6.000000e-01 : f32
    %736 = vector.broadcast %cst_269 : f32 to vector<1x4xf32>
    %737 = arith.subf %397, %736 : vector<1x4xf32>
    %cst_270 = arith.constant 0.833333313 : f32
    %738 = vector.broadcast %cst_270 : f32 to vector<1x4xf32>
    %739 = arith.mulf %737, %738 : vector<1x4xf32>
    %740 = arith.mulf %739, %647 : vector<1x4xf32>
    %cst_271 = arith.constant 1.000000e+00 : f32
    %741 = vector.broadcast %cst_271 : f32 to vector<1x4xf32>
    %742 = arith.subf %741, %397 : vector<1x4xf32>
    %cst_272 = arith.constant 0.833333313 : f32
    %743 = vector.broadcast %cst_272 : f32 to vector<1x4xf32>
    %744 = arith.mulf %742, %743 : vector<1x4xf32>
    %745 = arith.mulf %744, %658 : vector<1x4xf32>
    %746 = arith.addf %740, %745 : vector<1x4xf32>
    %cst_273 = arith.constant -2.000000e-01 : f32
    %747 = vector.broadcast %cst_273 : f32 to vector<1x4xf32>
    %748 = arith.subf %397, %747 : vector<1x4xf32>
    %cst_274 = arith.constant 0.833333313 : f32
    %749 = vector.broadcast %cst_274 : f32 to vector<1x4xf32>
    %750 = arith.mulf %748, %749 : vector<1x4xf32>
    %751 = arith.mulf %750, %658 : vector<1x4xf32>
    %cst_275 = arith.constant 1.400000e+00 : f32
    %752 = vector.broadcast %cst_275 : f32 to vector<1x4xf32>
    %753 = arith.subf %752, %397 : vector<1x4xf32>
    %cst_276 = arith.constant 0.833333313 : f32
    %754 = vector.broadcast %cst_276 : f32 to vector<1x4xf32>
    %755 = arith.mulf %753, %754 : vector<1x4xf32>
    %756 = arith.mulf %755, %669 : vector<1x4xf32>
    %757 = arith.addf %751, %756 : vector<1x4xf32>
    %cst_277 = arith.constant 2.000000e-01 : f32
    %758 = vector.broadcast %cst_277 : f32 to vector<1x4xf32>
    %759 = arith.subf %397, %758 : vector<1x4xf32>
    %cst_278 = arith.constant 0.833333313 : f32
    %760 = vector.broadcast %cst_278 : f32 to vector<1x4xf32>
    %761 = arith.mulf %759, %760 : vector<1x4xf32>
    %762 = arith.mulf %761, %669 : vector<1x4xf32>
    %cst_279 = arith.constant 1.800000e+00 : f32
    %763 = vector.broadcast %cst_279 : f32 to vector<1x4xf32>
    %764 = arith.subf %763, %397 : vector<1x4xf32>
    %cst_280 = arith.constant 0.833333313 : f32
    %765 = vector.broadcast %cst_280 : f32 to vector<1x4xf32>
    %766 = arith.mulf %764, %765 : vector<1x4xf32>
    %767 = arith.mulf %766, %680 : vector<1x4xf32>
    %768 = arith.addf %762, %767 : vector<1x4xf32>
    %cst_281 = arith.constant 6.000000e-01 : f32
    %769 = vector.broadcast %cst_281 : f32 to vector<1x4xf32>
    %770 = arith.subf %397, %769 : vector<1x4xf32>
    %cst_282 = arith.constant 0.833333313 : f32
    %771 = vector.broadcast %cst_282 : f32 to vector<1x4xf32>
    %772 = arith.mulf %770, %771 : vector<1x4xf32>
    %773 = arith.mulf %772, %680 : vector<1x4xf32>
    %cst_283 = arith.constant 2.200000e+00 : f32
    %774 = vector.broadcast %cst_283 : f32 to vector<1x4xf32>
    %775 = arith.subf %774, %397 : vector<1x4xf32>
    %cst_284 = arith.constant 0.833333313 : f32
    %776 = vector.broadcast %cst_284 : f32 to vector<1x4xf32>
    %777 = arith.mulf %775, %776 : vector<1x4xf32>
    %778 = arith.mulf %777, %691 : vector<1x4xf32>
    %779 = arith.addf %773, %778 : vector<1x4xf32>
    %c0_285 = arith.constant 0 : index
    %c0_286 = arith.constant 0 : index
    %780 = vector.load %arg7[%c0_285, %c0_286] : memref<1x32xf32, #tpu.memory_space<vmem>>, vector<1x4xf32>
    tpu.vector_store %arg7[%c0_285, %c0_286], %702 {strides = array<i32>} : memref<1x32xf32, #tpu.memory_space<vmem>>, vector<1x4xf32>,
    %c0_287 = arith.constant 0 : index
    %c4_288 = arith.constant 4 : index
    %781 = vector.load %arg7[%c0_287, %c4_288] : memref<1x32xf32, #tpu.memory_space<vmem>>, vector<1x4xf32>
    tpu.vector_store %arg7[%c0_287, %c4_288], %713 {strides = array<i32>} : memref<1x32xf32, #tpu.memory_space<vmem>>, vector<1x4xf32>,
    %c0_289 = arith.constant 0 : index
    %c8_290 = arith.constant 8 : index
    %782 = vector.load %arg7[%c0_289, %c8_290] : memref<1x32xf32, #tpu.memory_space<vmem>>, vector<1x4xf32>
    tpu.vector_store %arg7[%c0_289, %c8_290], %724 {strides = array<i32>} : memref<1x32xf32, #tpu.memory_space<vmem>>, vector<1x4xf32>,
    %c0_291 = arith.constant 0 : index
    %c12_292 = arith.constant 12 : index
    %783 = vector.load %arg7[%c0_291, %c12_292] : memref<1x32xf32, #tpu.memory_space<vmem>>, vector<1x4xf32>
    tpu.vector_store %arg7[%c0_291, %c12_292], %735 {strides = array<i32>} : memref<1x32xf32, #tpu.memory_space<vmem>>, vector<1x4xf32>,
    %c0_293 = arith.constant 0 : index
    %c16_294 = arith.constant 16 : index
    %784 = vector.load %arg7[%c0_293, %c16_294] : memref<1x32xf32, #tpu.memory_space<vmem>>, vector<1x4xf32>
    tpu.vector_store %arg7[%c0_293, %c16_294], %746 {strides = array<i32>} : memref<1x32xf32, #tpu.memory_space<vmem>>, vector<1x4xf32>,
    %c0_295 = arith.constant 0 : index
    %c20_296 = arith.constant 20 : index
    %785 = vector.load %arg7[%c0_295, %c20_296] : memref<1x32xf32, #tpu.memory_space<vmem>>, vector<1x4xf32>
    tpu.vector_store %arg7[%c0_295, %c20_296], %757 {strides = array<i32>} : memref<1x32xf32, #tpu.memory_space<vmem>>, vector<1x4xf32>,
    %c0_297 = arith.constant 0 : index
    %c24_298 = arith.constant 24 : index
    %786 = vector.load %arg7[%c0_297, %c24_298] : memref<1x32xf32, #tpu.memory_space<vmem>>, vector<1x4xf32>
    tpu.vector_store %arg7[%c0_297, %c24_298], %768 {strides = array<i32>} : memref<1x32xf32, #tpu.memory_space<vmem>>, vector<1x4xf32>,
    %c0_299 = arith.constant 0 : index
    %c28_300 = arith.constant 28 : index
    %787 = vector.load %arg7[%c0_299, %c28_300] : memref<1x32xf32, #tpu.memory_space<vmem>>, vector<1x4xf32>
    tpu.vector_store %arg7[%c0_299, %c28_300], %779 {strides = array<i32>} : memref<1x32xf32, #tpu.memory_space<vmem>>, vector<1x4xf32>,
    %c0_301 = arith.constant 0 : index
    %c0_302 = arith.constant 0 : index
    %788 = vector.load %arg7[%c0_301, %c0_302] : memref<1x32xf32, #tpu.memory_space<vmem>>, vector<1x32xf32>
    %c0_303 = arith.constant 0 : index
    %c0_304 = arith.constant 0 : index
    %789 = vector.load %arg5[%c0_303, %c0_304] : memref<32x4xf32, #tpu.memory_space<vmem>>, vector<32x4xf32>
    %cst_305 = arith.constant dense<0.000000e+00> : vector<1x4xf32>
    %790 = tpu.matmul %788, %789, %cst_305 {dimension_numbers = #tpu.dot_dimension_numbers<[1], [0], [0], [1], [0, 0, 1, 1], [], []>} : vector<1x32xf32>, vector<32x4xf32>, vector<1x4xf32> -> vector<1x4xf32>
    %791 = arith.addf %405, %790 : vector<1x4xf32>
    %cst_306 = arith.constant 1.000000e+00 : f32
    %792 = vector.broadcast %cst_306 : f32 to vector<1x4xf32>
    %793 = arith.addf %791, %792 : vector<1x4xf32>
    %794 = vector.shape_cast %793 : vector<1x4xf32> to vector<1x4x1xf32>
    %795 = vector.broadcast %794 : vector<1x4x1xf32> to vector<1x4x256xf32>
    %796 = arith.mulf %0, %795 : vector<1x4x256xf32>
    %c0_307 = arith.constant 0 : index
    %c0_308 = arith.constant 0 : index
    %c0_309 = arith.constant 0 : index
    %797 = vector.load %arg6[%c0_307, %c0_308, %c0_309] : memref<1x4x256xf32, #tpu.memory_space<vmem>>, vector<1x4x256xf32>
    tpu.vector_store %arg6[%c0_307, %c0_308, %c0_309], %796 {strides = array<i32>} : memref<1x4x256xf32, #tpu.memory_space<vmem>>, vector<1x4x256xf32>,
    return
  }
  func.func @transform_0(%arg0: i32) -> (i32, i32, i32) {
    %c0_i32 = arith.constant 0 : i32
    %c0_i32_0 = arith.constant 0 : i32
    %c0_i32_1 = arith.constant 0 : i32
    return %arg0, %c0_i32, %c0_i32_0 : i32, i32, i32
  }
  func.func @transform_1(%arg0: i32) -> (i32, i32) {
    %c0_i32 = arith.constant 0 : i32
    %c0_i32_0 = arith.constant 0 : i32
    %c0_i32_1 = arith.constant 0 : i32
    return %c0_i32, %c0_i32_0 : i32, i32
  }
  func.func @transform_2(%arg0: i32) -> (i32, i32) {
    %c0_i32 = arith.constant 0 : i32
    %c0_i32_0 = arith.constant 0 : i32
    %c0_i32_1 = arith.constant 0 : i32
    return %c0_i32, %c0_i32_0 : i32, i32
  }
  func.func @transform_3(%arg0: i32) -> (i32, i32) {
    %c0_i32 = arith.constant 0 : i32
    %c0_i32_0 = arith.constant 0 : i32
    %c0_i32_1 = arith.constant 0 : i32
    return %c0_i32, %c0_i32_0 : i32, i32
  }
  func.func @transform_4(%arg0: i32) -> (i32, i32) {
    %c0_i32 = arith.constant 0 : i32
    %c0_i32_0 = arith.constant 0 : i32
    %c0_i32_1 = arith.constant 0 : i32
    return %c0_i32, %c0_i32_0 : i32, i32
  }
  func.func @transform_5(%arg0: i32) -> (i32, i32, i32) {
    %c0_i32 = arith.constant 0 : i32
    %c0_i32_0 = arith.constant 0 : i32
    %c0_i32_1 = arith.constant 0 : i32
    return %arg0, %c0_i32, %c0_i32_0 : i32, i32, i32
  }
}

</mosaic_0001>

<bundles_post_ra>
// kernel: tpu_custom_call.1
= control target key start
LH: loop header
LB: loop body
LE: loop exit
PB: predicated region body
PF: predicated region fallthrough
CT: control target
= control target key end

     0   :  { %10 = vsyncpa [#allocation4], 0  ;;  %s1948_s0 = inlined_call_operand.vmem [shape: f32[2,4,256], index: 0, kind: input, shape index: {}]   ;;  %s1949_s1 = inlined_call_operand.vmem [shape: f32[4,4], index: 1, kind: input, shape index: {}]   ;;  %s1950_s2 = inlined_call_operand.vmem [shape: f32[32,4], index: 2, kind: input, shape index: {}]   ;;  %s1951_s3 = inlined_call_operand.vmem [shape: f32[4,4], index: 3, kind: input, shape index: {}]   ;;  %s1952_s4 = inlined_call_operand.vmem [shape: f32[32,4], index: 4, kind: input, shape index: {}]   ;;  %s1953_s5 = inlined_call_operand.hbm [shape: f32[2,4,256], index: 5, kind: output, shape index: {}]  }
   0x1   :  { %12 = vsyncpa [#allocation4 + $0x1], 0  ;;  %s1476_s18 = smov 0   ;;  %s1478_s19 = smov 0  }
   0x2   :  { %s1480_s20 = smov 0   ;;  %s1482_s21 = smov 0  }
   0x3 LB: > { %s1497_s22 = sadd.s32 4294967295, %s1432_s21   ;;  %s1186_s23 = sadd.s32 4294967294, %s1432_s21   ;;  %s1432_s21 = sphi %s1482_s21, %s1981_s21   ;;  %s1428_s20 = sphi %s1480_s20, %s1980_s20   ;;  %s1424_s19 = sphi %s1478_s19, %s1979_s19   ;;  %s1420_s18 = sphi %s1476_s18, %s1978_s18  }
   0x4   : > { %s1501_s24 = sadd.s32 1, %s1432_s21   ;;  %s135_s25 = sadd.s32 1, %s1428_s20 }
   0x5   : > { %s132_s26 = ssub.s32 %s1432_s21, %s1501_s24  ;;  %p145_p0 = scmp.ne.s32.totalorder %s1428_s20, %s1424_s19 }
   0x6   : > { %p133_p1 = scmp.eq.s32.totalorder %s132_s26, 0  ;;  %p146_p2 = scmp.eq.s32.totalorder %s1497_s22, 1 }
   0x7   : > { %p151_p3 = scmp.ne.s32.totalorder %s1424_s19, %s1420_s18  ;;  %p152_p4 = scmp.eq.s32.totalorder %s1186_s23, 1 }
   0x8   : > { %s1512_s27 = scalar_select %p133_p1, %s1428_s20, %s135_s25  }
   0x9   : > { %p1514_p5 = por %p146_p2, %p145_p0  ;;  %p1518_p6 = por %p152_p4, %p151_p3 }
   0xa   : > { %p1189_p7 = scmp.ge.s32.totalorder %s1432_s21, 1  ;;  %p190_p8 = scmp.lt.s32.totalorder %s1432_s21, 3 }
   0xc   : > { %p191_p9 = pnand %p1189_p7, %p190_p8 }
   0xd   : > { %p218_p10 = scmp.lt.s32.totalorder (!%p191_p9), %s1497_s22, 1  ;;  %vm1957_vm0 = vcmask (!%p191_p9), 1043456   ;;  %v526_v5 = vld [vmem:[%s1950_s2] sm:$0xff] (!%p191_p9)  ;;  %v527_v6 = vld [vmem:[%s1950_s2 + $0x8] sm:$0xff] (!%p191_p9)  ;;  %v528_v7 = vld [vmem:[%s1950_s2 + $0x10] sm:$0xff] (!%p191_p9)  ;;  %v1954_v8 = vmov (!%p191_p9), 0.0|0.0   ;;  %v453_v13 = vlaneseq (!%p191_p9) }
   0xe   : > { %194 = sbr.rel (%p191_p9) target bundleno = 995 (0x3e3), region = 40  ;;  %1296 = vmatprep.subr.bf16.mxu0 (!%p191_p9), %v1954_v8  ;;  %v1297_v9 = vpack.c.bf16 (!%p191_p9), %v527_v6, %v526_v5  ;;  %v529_v10 = vld [vmem:[%s1950_s2 + $0x18] sm:$0xff] (!%p191_p9)  ;;  %vm1958_vm1 = vmmov (!%p191_p9), 0   ;;  %v1955_v11 = vmov (!%p191_p9), 0.0   ;;  %1302 = vmatprep.subr.bf16.mxu1 (!%p191_p9), %v1954_v8  ;;  %s1437_s26 = smov (!%p191_p9), 8  }
   0xf   : > { %1272 = vmatprep.mubr.msk.f32.mxu0 (!%p191_p9), %vm1958_vm1, %v1955_v11  ;;  %1288 = vmatprep.mubr.msk.f32.mxu1 (!%p191_p9), %vm1958_vm1, %v1955_v11  ;;  %v1300_v12 = vpack.c.bf16 (!%p191_p9), %v529_v10, %v528_v7  ;;  %v454_v14 = vand.u32 (!%p191_p9), 127, %v453_v13  ;;  %v1554_v15 = vshrl.u32 (!%p191_p9), %v453_v13, 7  ;;  %s1440_s7 = smov (!%p191_p9), 16   ;;  %s1441_s17 = smov (!%p191_p9), 20  }
  0x10   : > { %1298 = vmatpush3.bf16.msra.mxu0 (!%p191_p9), %v1297_v9  ;;  %s1442_s23 = smov (!%p191_p9), 24   ;;  %s1443_s25 = smov (!%p191_p9), 28  }
  0x11   : > { %1299 = vmatprep.subr.bf16.mxu0 (!%p191_p9), %v1954_v8  ;;  %v1556_v16 = vadd.s32 (!%p191_p9), 4294967292, %v454_v14  ;;  %v1558_v17 = vadd.s32 (!%p191_p9), 4294967288, %v454_v14  ;;  %v1560_v19 = vadd.s32 (!%p191_p9), 4294967284, %v454_v14  ;;  %v1565_v22 = vsub.s32 (!%p191_p9), %v454_v14, %v1554_v15  ;;  %s1249_s8 = sshll.u32 (!%p191_p9), %s1497_s22, 7 }
  0x12   : > { %v1567_v23 = vadd.s32 (!%p191_p9), 4294967280, %v454_v14  ;;  %v1569_v24 = vadd.s32 (!%p191_p9), 4294967276, %v454_v14  ;;  %v1571_v25 = vadd.s32 (!%p191_p9), 4294967272, %v454_v14  ;;  %v1586_v30 = vadd.s32 (!%p191_p9), 4294967268, %v454_v14  ;;  %s1906_s14 = scalar_lea.hbm (!%p191_p9), %s1953_s5, %s1249_s8 }
  0x13   : > { %v466_v26 = vsub.s32 (!%p191_p9), %v1556_v16, %v1554_v15 }
  0x14   : > { %1301 = vmatpush3.bf16.msra.mxu0 (!%p191_p9), %v1300_v12 }
  0x15   : > { %s219_s30 = scalar_select %p218_p10, %s1497_s22, 1  ;;  %1275 = vmatprep.subr.mxu0 %v1955_v11 }
  0x16   : > { %s1445_s22 = smov [#allocation3]  }
  0x17   : > { %s1248_s6 = sshll.u32 %s219_s30, 3  ;;  %s1438_s30 = smov 4  }
  0x18   : > { %s1529_s9 = scalar_lea.vmem %s1948_s0, %s1248_s6  ;;  %s1439_s6 = smov 12  }
  0x19   : > { %v223_v0 = vld [vmem:[%s1529_s9] sm:$0xff] }
  0x1a   : > { %v225_v1 = vcombine.high %v223_v0, %v223_v0  ;;  %v228_v2 = vsel %vm1957_vm0, %v223_v0, 0.0 }
  0x1c   : > { %v229_v3 = vsel %vm1957_vm0, %v225_v1, 0.0 }
  0x1d   : > { %v230_v4 = vadd.f32 %v229_v3, %v228_v2 }
  0x1f   : > { %231 = vadd.xlane.f32.xlu0 %v230_v4 }
  0xac   : > { %v232_v18 = vpop.xlane.xlu0 %231 }
  0xad   : > { %v1562_v20 = vmul.f32 0.00390625, %v232_v18  ;;  %v1193_v21 = vmul.f32 -0.00390625, %v232_v18 }
  0xaf   : > { %vm242_vm2 = vcmp.ge.f32.partialorder %v1562_v20, -2.2  ;;  %vm243_vm3 = vcmp.lt.f32.partialorder %v1562_v20, -1.8  ;;  %vm247_vm5 = vcmp.ge.f32.partialorder %v1562_v20, -1.8 }
  0xb0   : > { %vm244_vm4 = vmand %vm242_vm2, %vm243_vm3  ;;  %vm248_vm6 = vcmp.lt.f32.partialorder %v1562_v20, -1.4  ;;  %vm252_vm7 = vcmp.ge.f32.partialorder %v1562_v20, -1.4  ;;  %v235_v29 = vmul.f32 1.442695, %v1193_v21 }
  0xb1   : > { %vm249_vm8 = vmand %vm247_vm5, %vm248_vm6  ;;  %vm253_vm9 = vcmp.lt.f32.partialorder %v1562_v20, -1.0  ;;  %vm257_vm10 = vcmp.ge.f32.partialorder %v1562_v20, -1.0  ;;  %v1194_v31 = vsel %vm244_vm4, 1.0, %v1955_v11  ;;  %vm258_vm12 = vcmp.lt.f32.partialorder %v1562_v20, -0.6 }
  0xb2   : > { %vm254_vm11 = vmand %vm252_vm7, %vm253_vm9  ;;  %vm262_vm13 = vcmp.ge.f32.partialorder %v1562_v20, -0.6  ;;  %v1195_v33 = vsel %vm249_vm8, 1.0, %v1955_v11  ;;  %vm263_vm15 = vcmp.lt.f32.partialorder %v1562_v20, -0.2  ;;  %vm278_vm3 = vcmp.lt.f32.partialorder %v1562_v20, 1.0 }
  0xb3   : > { %vm259_vm14 = vmand %vm257_vm10, %vm258_vm12  ;;  %vm267_vm2 = vcmp.ge.f32.partialorder %v1562_v20, -0.2  ;;  %v1196_v34 = vsel %vm254_vm11, 1.0, %v1955_v11  ;;  %vm268_vm5 = vcmp.lt.f32.partialorder %v1562_v20, 0.2  ;;  %v307_v35 = vsub.f32 -1.0, %v1562_v20 }
  0xb4   : > { %vm264_vm4 = vmand %vm262_vm13, %vm263_vm15  ;;  %vm272_vm6 = vcmp.ge.f32.partialorder %v1562_v20, 0.2  ;;  %vm273_vm9 = vcmp.lt.f32.partialorder %v1562_v20, 0.6  ;;  %vm277_vm8 = vcmp.ge.f32.partialorder %v1562_v20, 0.6  ;;  %1361 = vpow2.f32 %v235_v29 }
  0xb5   : > { %vm269_vm7 = vmand %vm267_vm2, %vm268_vm5  ;;  %vm282_vm10 = vcmp.ge.f32.partialorder %v1562_v20, 1.0  ;;  %v1605_v36 = vadd.f32 1.0, %v1562_v20  ;;  %v1197_v37 = vsel %vm259_vm14, 1.0, %v1955_v11  ;;  %v1198_v38 = vsel %vm264_vm4, 1.0, %v1955_v11 }
  0xb6   : > { %vm274_vm11 = vmand %vm272_vm6, %vm273_vm9  ;;  %vm283_vm12 = vcmp.lt.f32.partialorder %v1562_v20, 1.4  ;;  %v308_v39 = vmul.f32 2.5, %v307_v35  ;;  %v1199_v40 = vsel %vm269_vm7, 1.0, %v1955_v11  ;;  %vm287_vm15 = vcmp.ge.f32.partialorder %v1562_v20, 1.4 }
  0xb7   : > { %v1200_v41 = vsel %vm274_vm11, 1.0, %v1955_v11  ;;  %vm279_vm13 = vmand %vm277_vm8, %vm278_vm3  ;;  %vm288_vm2 = vcmp.lt.f32.partialorder %v1562_v20, 1.8  ;;  %vm292_vm4 = vcmp.ge.f32.partialorder %v1562_v20, 1.8  ;;  %v319_v44 = vmul.f32 2.5, %v1605_v36 }
  0xb8   : > { %v1619_v42 = vsel %vm279_vm13, 1.0, %v1955_v11  ;;  %vm284_vm14 = vmand %vm282_vm10, %vm283_vm12  ;;  %v1623_v43 = vadd.f32 2.2, %v1562_v20  ;;  %vm293_vm5 = vcmp.lt.f32.partialorder %v1562_v20, 2.2  ;;  %v309_v48 = vmul.f32 %v1196_v34, %v308_v39 }
  0xb9   : > { %v300_v45 = vsub.f32 -1.4, %v1562_v20  ;;  %v1629_v46 = vadd.f32 1.8, %v1562_v20  ;;  %v1633_v49 = vadd.f32 1.4, %v1562_v20  ;;  %vm289_vm3 = vmand %vm287_vm15, %vm288_vm2  ;;  %v320_v58 = vmul.f32 %v1197_v37, %v319_v44 }
  0xba   : > { %v298_v47 = vmul.f32 2.5, %v1623_v43  ;;  %v1636_v50 = vsub.f32 -0.6, %v1562_v20  ;;  %v1202_v51 = vsel %vm284_vm14, 1.0, %v1955_v11  ;;  %v1645_v54 = vsub.f32 -0.2, %v1562_v20  ;;  %vm294_vm6 = vmand %vm292_vm4, %vm293_vm5 }
  0xbb   : > { %v301_v52 = vmul.f32 2.5, %v300_v45  ;;  %v305_v53 = vmul.f32 2.5, %v1629_v46  ;;  %v312_v56 = vmul.f32 2.5, %v1633_v49  ;;  %v1653_v62 = vadd.f32 0.6, %v1562_v20 }
  0xbc   : > { %v299_v55 = vmul.f32 %v1194_v31, %v298_v47  ;;  %v315_v57 = vmul.f32 2.5, %v1636_v50  ;;  %v322_v61 = vmul.f32 2.5, %v1645_v54  ;;  %v1203_v63 = vsel %vm289_vm3, 1.0, %v1955_v11 }
  0xbd   : > { %v302_v59 = vmul.f32 %v1195_v33, %v301_v52  ;;  %v306_v60 = vmul.f32 %v1195_v33, %v305_v53  ;;  %v313_v0 = vmul.f32 %v1196_v34, %v312_v56  ;;  %v1657_v2 = vsub.f32 0.2, %v1562_v20 }
  0xbe   : > { %v316_v1 = vmul.f32 %v1197_v37, %v315_v57  ;;  %v1204_v3 = vsel %vm294_vm6, 1.0, %v1955_v11  ;;  %v326_v6 = vmul.f32 2.5, %v1653_v62  ;;  %v323_v7 = vmul.f32 %v1198_v38, %v322_v61  ;;  %v1679_v37 = vpop.eup %1361 }
  0xbf   : > { %v303_v4 = vadd.f32 %v302_v59, %v299_v55  ;;  %v310_v5 = vadd.f32 %v309_v48, %v306_v60  ;;  %v329_v9 = vmul.f32 2.5, %v1657_v2  ;;  %v1663_v10 = vadd.f32 0.2, %v1562_v20 }
  0xc0   : > { %v1666_v12 = vsub.f32 0.6, %v1562_v20  ;;  %v317_v13 = vadd.f32 %v316_v1, %v313_v0  ;;  %v327_v14 = vmul.f32 %v1198_v38, %v326_v6  ;;  %v1669_v18 = vadd.f32 -0.2, %v1562_v20 }
  0xc1   : > { %v1672_v21 = vsub.f32 1.0, %v1562_v20  ;;  %v330_v29 = vmul.f32 %v1199_v40, %v329_v9  ;;  %v333_v31 = vmul.f32 2.5, %v1663_v10  ;;  %v1677_v34 = vadd.f32 -0.6, %v1562_v20 }
  0xc2   : > { %v336_v33 = vmul.f32 2.5, %v1666_v12  ;;  %v340_v39 = vmul.f32 2.5, %v1669_v18  ;;  %v1684_v44 = vsub.f32 1.4, %v1562_v20  ;;  %v1687_v45 = vadd.f32 -1.0, %v1562_v20 }
  0xc3   : > { %v343_v38 = vmul.f32 2.5, %v1672_v21  ;;  %v324_v47 = vadd.f32 %v323_v7, %v320_v58  ;;  %v334_v48 = vmul.f32 %v1199_v40, %v333_v31  ;;  %v347_v53 = vmul.f32 2.5, %v1677_v34 }
  0xc4   : > { %v337_v52 = vmul.f32 %v1200_v41, %v336_v33  ;;  %v341_v55 = vmul.f32 %v1200_v41, %v340_v39  ;;  %v350_v57 = vmul.f32 2.5, %v1684_v44  ;;  %v354_v59 = vmul.f32 2.5, %v1687_v45 }
  0xc5   : > { %v344_v56 = vmul.f32 %v1619_v42, %v343_v38  ;;  %v331_v60 = vadd.f32 %v330_v29, %v327_v14  ;;  %v1694_v0 = vsub.f32 1.8, %v1562_v20  ;;  %v1214_v1 = vadd.f32 -1.4, %v1562_v20 }
  0xc6   : > { %v338_v61 = vadd.f32 %v337_v52, %v334_v48  ;;  %v348_v58 = vmul.f32 %v1619_v42, %v347_v53  ;;  %v351_v40 = vmul.f32 %v1202_v51, %v350_v57  ;;  %v355_v6 = vmul.f32 %v1202_v51, %v354_v59 }
  0xc7   : > { %v1699_v7 = vsub.f32 2.2, %v1562_v20  ;;  %v357_v41 = vmul.f32 2.5, %v1694_v0  ;;  %v361_v9 = vmul.f32 2.5, %v1214_v1  ;;  %v367_v31 = vmul.f32 1.25, %v1623_v43 }
  0xc8   : > { %v369_v14 = vmul.f32 1.25, %v307_v35  ;;  %v345_v29 = vadd.f32 %v344_v56, %v341_v55  ;;  %v372_v39 = vmul.f32 1.25, %v1629_v46  ;;  %v374_v42 = vmul.f32 1.25, %v1636_v50 }
  0xc9   : > { %v364_v33 = vmul.f32 2.5, %v1699_v7  ;;  %v358_v38 = vmul.f32 %v1203_v63, %v357_v41  ;;  %v362_v51 = vmul.f32 %v1203_v63, %v361_v9  ;;  %v368_v48 = vmul.f32 %v367_v31, %v303_v4 }
  0xca   : > { %v370_v52 = vmul.f32 %v369_v14, %v310_v5  ;;  %v352_v53 = vadd.f32 %v351_v40, %v348_v58  ;;  %v373_v59 = vmul.f32 %v372_v39, %v310_v5  ;;  %v377_v1 = vmul.f32 1.25, %v1633_v49 }
  0xcb   : > { %v365_v57 = vmul.f32 %v1204_v3, %v364_v33  ;;  %v359_v8 = vadd.f32 %v358_v38, %v355_v6  ;;  %v375_v11 = vmul.f32 %v374_v42, %v317_v13  ;;  %v379_v35 = vmul.f32 1.25, %v1645_v54 }
  0xcc   : > { %v382_v55 = vmul.f32 1.25, %v1605_v36  ;;  %v371_v32 = vadd.f32 %v370_v52, %v368_v48  ;;  %v378_v28 = vmul.f32 %v377_v1, %v317_v13  ;;  %v384_v27 = vmul.f32 1.25, %v1657_v2 }
  0xcd   : > { %v366_v56 = vadd.f32 %v365_v57, %v362_v51  ;;  %v380_v41 = vmul.f32 %v379_v35, %v324_v47  ;;  %v387_v4 = vmul.f32 1.25, %v1653_v62  ;;  %v389_v3 = vmul.f32 1.25, %v1666_v12 }
  0xce   : > { %v383_v63 = vmul.f32 %v382_v55, %v324_v47  ;;  %v385_v5 = vmul.f32 %v384_v27, %v331_v60  ;;  %v392_v58 = vmul.f32 1.25, %v1663_v10  ;;  %v394_v40 = vmul.f32 1.25, %v1672_v21 }
  0xcf   : > { %v397_v6 = vmul.f32 1.25, %v1669_v18  ;;  %v376_v9 = vadd.f32 %v375_v11, %v373_v59  ;;  %v388_v31 = vmul.f32 %v387_v4, %v331_v60  ;;  %v390_v14 = vmul.f32 %v389_v3, %v338_v61 }
  0xd0   : > { %v399_v13 = vmul.f32 1.25, %v1684_v44  ;;  %v381_v33 = vadd.f32 %v380_v41, %v378_v28  ;;  %v393_v39 = vmul.f32 %v392_v58, %v338_v61  ;;  %v395_v42 = vmul.f32 %v394_v40, %v345_v29 }
  0xd1   : > { %v398_v47 = vmul.f32 %v397_v6, %v345_v29  ;;  %v386_v38 = vadd.f32 %v385_v5, %v383_v63  ;;  %v402_v48 = vmul.f32 1.25, %v1677_v34  ;;  %v404_v27 = vmul.f32 1.25, %v1694_v0 }
  0xd2   : > { %v400_v51 = vmul.f32 %v399_v13, %v352_v53  ;;  %v391_v52 = vadd.f32 %v390_v14, %v388_v31  ;;  %v396_v57 = vadd.f32 %v395_v42, %v393_v39  ;;  %v407_v1 = vmul.f32 1.25, %v1687_v45 }
  0xd3   : > { %v412_v11 = vmul.f32 0.8333333, %v1623_v43  ;;  %v403_v60 = vmul.f32 %v402_v48, %v352_v53  ;;  %v405_v59 = vmul.f32 %v404_v27, %v359_v8  ;;  %v409_v35 = vmul.f32 1.25, %v1699_v7 }
  0xd4   : > { %v414_v28 = vmul.f32 0.8333333, %v1636_v50  ;;  %v401_v61 = vadd.f32 %v400_v51, %v398_v47  ;;  %v408_v29 = vmul.f32 %v407_v1, %v359_v8  ;;  %v417_v41 = vmul.f32 0.8333333, %v1629_v46 }
  0xd5   : > { %v413_v55 = vmul.f32 %v412_v11, %v371_v32  ;;  %vm460_vm7 = vcmask 24576   ;;  %v410_v63 = vmul.f32 %v409_v35, %v366_v56  ;;  %v419_v3 = vmul.f32 0.8333333, %v1645_v54 }
  0xd6   : > { %v415_v4 = vmul.f32 %v414_v28, %v376_v9  ;;  %v422_v45 = vmul.f32 0.8333333, %v1633_v49  ;;  %vm469_vm9 = vcmask 57376   ;;  %v406_v43 = vadd.f32 %v405_v59, %v403_v60 }
  0xd7   : > { %v418_v53 = vmul.f32 %v417_v41, %v376_v9  ;;  %v424_v5 = vmul.f32 0.8333333, %v1657_v2  ;;  %v427_v58 = vmul.f32 0.8333333, %v1605_v36  ;;  %vm478_vm8 = vcmask 90176  }
  0xd8   : > { %v416_v50 = vadd.f32 %v415_v4, %v413_v55  ;;  %v420_v8 = vmul.f32 %v419_v3, %v381_v33  ;;  %v423_v32 = vmul.f32 %v422_v45, %v381_v33  ;;  %v429_v46 = vmul.f32 0.8333333, %v1666_v12 }
  0xd9   : > { %vm487_vm10 = vcmask 122976   ;;  %v425_v56 = vmul.f32 %v424_v5, %v386_v38  ;;  %v428_v40 = vmul.f32 %v427_v58, %v386_v38  ;;  %v432_v54 = vmul.f32 0.8333333, %v1653_v62 }
  0xda   : > { %v434_v49 = vmul.f32 0.8333333, %v1672_v21  ;;  %v421_v6 = vadd.f32 %v420_v8, %v418_v53  ;;  %v430_v31 = vmul.f32 %v429_v46, %v391_v52  ;;  %v437_v9 = vmul.f32 0.8333333, %v1663_v10 }
  0xdb   : > { %v439_v2 = vmul.f32 0.8333333, %v1684_v44  ;;  %v411_v36 = vadd.f32 %v410_v63, %v408_v29  ;;  %v433_v14 = vmul.f32 %v432_v54, %v391_v52  ;;  %v442_v33 = vmul.f32 0.8333333, %v1669_v18 }
  0xdc   : > { %v435_v13 = vmul.f32 %v434_v49, %v396_v57  ;;  %v426_v39 = vadd.f32 %v425_v56, %v423_v32  ;;  %v438_v12 = vmul.f32 %v437_v9, %v396_v57  ;;  %v444_v47 = vmul.f32 0.8333333, %v1694_v0 }
  0xdd   : > { %v440_v42 = vmul.f32 %v439_v2, %v401_v61  ;;  %v431_v38 = vadd.f32 %v430_v31, %v428_v40  ;;  %v443_v62 = vmul.f32 %v442_v33, %v401_v61  ;;  %v447_v21 = vmul.f32 0.8333333, %v1677_v34 }
  0xde   : > { %v449_v51 = vmul.f32 0.8333333, %v1699_v7  ;;  %v436_v48 = vadd.f32 %v435_v13, %v433_v14  ;;  %v445_v10 = vmul.f32 %v444_v47, %v406_v43  ;;  %v458_v44 = vrot.slane %v416_v50, %v1565_v22 }
  0xdf   : > { %v467_v27 = vrot.slane %v421_v6, %v466_v26  ;;  %v441_v18 = vadd.f32 %v440_v42, %v438_v12  ;;  %v448_v52 = vmul.f32 %v447_v21, %v406_v43  ;;  %v502_v0 = vsub.s32 %v1569_v24, %v1554_v15 }
  0xe0   : > { %v450_v57 = vmul.f32 %v449_v51, %v411_v36  ;;  %v237_v1 = vadd.f32 1.0, %v1679_v37  ;;  %v446_v11 = vadd.f32 %v445_v10, %v443_v62  ;;  %461 = vst.msk [vmem:[#allocation2] sm:$0x1] %vm460_vm7, %v458_v44  ;;  %v1966_v34 = vsub.s32 %v1558_v17, %v1554_v15 }
  0xe1   : > { %v511_v60 = vsub.s32 %v1571_v25, %v1554_v15  ;;  %470 = vst.msk [vmem:[#allocation2] sm:$0x1] %vm469_vm9, %v467_v27  ;;  %v1967_v26 = vsub.s32 %v1560_v19, %v1554_v15  ;;  %vm496_vm11 = vcmask 155776   ;;  %v520_v24 = vsub.s32 %v1586_v30, %v1554_v15 }
  0xe2   : > { %v476_v7 = vrot.slane %v426_v39, %v1966_v34  ;;  %v451_v16 = vadd.f32 %v450_v57, %v448_v52  ;;  %v1968_v17 = vsub.s32 %v1567_v23, %v1554_v15  ;;  %vm1963_vm12 = vcmask 188576   ;;  %v241_v23 = vld [vmem:[%s1949_s1] sm:$0xf] }
  0xe3   : > { %v485_v59 = vrot.slane %v431_v38, %v1967_v26  ;;  %v503_v25 = vrot.slane %v441_v18, %v502_v0  ;;  %vm1961_vm13 = vcmask 221376   ;;  %1363 = vrcp.f32 %v237_v1 }
  0xe4   : > { %479 = vst.msk [vmem:[#allocation2] sm:$0x1] %vm478_vm8, %v476_v7  ;;  %v494_v37 = vrot.slane %v436_v48, %v1968_v17  ;;  %v512_v19 = vrot.slane %v446_v11, %v511_v60  ;;  %vm1960_vm15 = vcmask 254176   ;;  %v521_v35 = vrot.slane %v451_v16, %v520_v24 }
  0xe5   : > { %488 = vst.msk [vmem:[#allocation2] sm:$0x1] %vm487_vm10, %v485_v59  ;;  %vm1959_vm2 = vcmask 261120   ;;  %v1969_v61 = vmov 0.0   ;;  %vm1962_vm14 = vcmask 31744  }
  0xe6   : > { %497 = vst.msk [vmem:[#allocation2] sm:$0x1] %vm496_vm11, %v494_v37 }
  0xe7   : > { %506 = vst.msk [vmem:[#allocation2] sm:$0x1] %vm1963_vm12, %v503_v25 }
  0xe8   : > { %515 = vst.msk [vmem:[#allocation2] sm:$0x1] %vm1961_vm13, %v512_v19 }
  0xe9   : > { %524 = vst.msk [vmem:[#allocation2] sm:$0x1] %vm1960_vm15, %v521_v35 }
  0xed   : > { %v1364_v30 = vpop.eup %1363 }
  0xee   : > { %v240_v29 = vmul.f32 %v1364_v30, %v1562_v20 }
  0xf0   : > { %v525_v28 = vld [vmem:[#allocation2] sm:$0x1]  ;;  %v608_v55 = vrot.slane %v240_v29, %v1565_v22 }
  0xf1   : > { %1273 = vmatmul.mubr.msk.f32.vlgmr.msra.gmra.mrb[0].mxu0 %vm1959_vm2, %v525_v28 }
  0xf2   : > { %1276 = vmatpush3.msk.msra.mxu0 %vm1957_vm0, %v241_v23  ;;  %1277 = vmatprep.mubr.msk.f32.mxu0 %vm1958_vm1, %v1969_v61 }
  0xf9   : > { %1278 = vmatmul.mubr.msk.f32.vlgmr.msra.gmra.mrb[0].mxu0 %vm1962_vm14, %v608_v55 }
 0x1cc   : > { %v1776_v41 = vpop.f32.mrb[0].mxu0 }
 0x1cd   : > { %v1279_v63 = vpop.f32.mrb[1].mxu0  ;;  %vm703_vm4 = vcmp.ge.f32.partialorder %v1776_v41, -1.4  ;;  %vm704_vm5 = vcmp.lt.f32.partialorder %v1776_v41, -1.0  ;;  %vm708_vm3 = vcmp.ge.f32.partialorder %v1776_v41, -1.0  ;;  %v758_v20 = vsub.f32 -1.0, %v1776_v41 }
 0x1ce   : > { %vm705_vm6 = vmand %vm703_vm4, %vm704_vm5  ;;  %vm709_vm0 = vcmp.lt.f32.partialorder %v1776_v41, -0.6  ;;  %vm713_vm1 = vcmp.ge.f32.partialorder %v1776_v41, -0.6  ;;  %vm714_vm2 = vcmp.lt.f32.partialorder %v1776_v41, -0.2 }
 0x1cf   : > { %vm710_vm15 = vmand %vm708_vm3, %vm709_vm0  ;;  %vm718_vm13 = vcmp.ge.f32.partialorder %v1776_v41, -0.2  ;;  %vm719_vm14 = vcmp.lt.f32.partialorder %v1776_v41, 0.2  ;;  %v1232_v22 = vadd.f32 1.4, %v1776_v41 }
 0x1d0   : > { %vm715_vm12 = vmand %vm713_vm1, %vm714_vm2  ;;  %v1789_v4 = vsub.f32 -0.6, %v1776_v41  ;;  %v1792_v3 = vadd.f32 1.0, %v1776_v41  ;;  %v1221_v45 = vsel %vm705_vm6, 1.0, %v1969_v61  ;;  %v1222_v43 = vsel %vm710_vm15, 1.0, %v1969_v61 }
 0x1d1   : > { %vm720_vm0 = vmand %vm718_vm13, %vm719_vm14  ;;  %v1797_v53 = vsub.f32 -0.2, %v1776_v41  ;;  %v1800_v5 = vadd.f32 0.6, %v1776_v41  ;;  %v1223_v58 = vsel %vm715_vm12, 1.0, %v1969_v61  ;;  %v763_v50 = vmul.f32 2.5, %v1232_v22 }
 0x1d2   : > { %v766_v8 = vmul.f32 2.5, %v1789_v4  ;;  %v770_v32 = vmul.f32 2.5, %v1792_v3  ;;  %v779_v40 = vsub.f32 0.2, %v1776_v41  ;;  %v1809_v54 = vadd.f32 0.2, %v1776_v41 }
 0x1d3   : > { %v773_v46 = vmul.f32 2.5, %v1797_v53  ;;  %v777_v56 = vmul.f32 2.5, %v1800_v5  ;;  %v1224_v49 = vsel %vm720_vm0, 1.0, %v1969_v61  ;;  %v764_v6 = vmul.f32 %v1221_v45, %v763_v50 }
 0x1d4   : > { %v767_v31 = vmul.f32 %v1222_v43, %v766_v8  ;;  %v771_v9 = vmul.f32 %v1222_v43, %v770_v32  ;;  %v780_v14 = vmul.f32 2.5, %v779_v40  ;;  %v759_v13 = vmul.f32 2.5, %v758_v20 }
 0x1d5   : > { %v774_v2 = vmul.f32 %v1223_v58, %v773_v46  ;;  %v778_v36 = vmul.f32 %v1223_v58, %v777_v56  ;;  %v784_v39 = vmul.f32 2.5, %v1809_v54  ;;  %v828_v12 = vmul.f32 1.25, %v1232_v22 }
 0x1d6   : > { %v768_v33 = vadd.f32 %v767_v31, %v764_v6  ;;  %v781_v47 = vmul.f32 %v1224_v49, %v780_v14  ;;  %v830_v38 = vmul.f32 1.25, %v1797_v53  ;;  %v833_v62 = vmul.f32 1.25, %v1792_v3 }
 0x1d7   : > { %v775_v42 = vadd.f32 %v774_v2, %v771_v9  ;;  %v835_v51 = vmul.f32 1.25, %v779_v40  ;;  %vm698_vm1 = vcmp.ge.f32.partialorder %v1776_v41, -1.8  ;;  %vm699_vm12 = vcmp.lt.f32.partialorder %v1776_v41, -1.4 }
 0x1d8   : > { %v829_v21 = vmul.f32 %v828_v12, %v768_v33  ;;  %v782_v48 = vadd.f32 %v781_v47, %v778_v36  ;;  %vm700_vm13 = vmand %vm698_vm1, %vm699_vm12  ;;  %v1230_v27 = vadd.f32 2.2, %v1776_v41  ;;  %v785_v18 = vmul.f32 %v1224_v49, %v784_v39 }
 0x1d9   : > { %v831_v10 = vmul.f32 %v830_v38, %v775_v42  ;;  %v834_v44 = vmul.f32 %v833_v62, %v775_v42  ;;  %v760_v52 = vmul.f32 %v1221_v45, %v759_v13  ;;  %v751_v57 = vsub.f32 -1.4, %v1776_v41 }
 0x1da   : > { %v1231_v0 = vadd.f32 1.8, %v1776_v41  ;;  %v836_v11 = vmul.f32 %v835_v51, %v782_v48  ;;  %v873_v34 = vmul.f32 0.8333333, %v1232_v22  ;;  %v1220_v7 = vsel %vm700_vm13, 1.0, %v1969_v61 }
 0x1db   : > { %v832_v1 = vadd.f32 %v831_v10, %v829_v21  ;;  %v875_v60 = vmul.f32 0.8333333, %v779_v40  ;;  %v752_v16 = vmul.f32 2.5, %v751_v57  ;;  %v820_v59 = vmul.f32 1.25, %v758_v20 }
 0x1dc   : > { %v756_v26 = vmul.f32 2.5, %v1231_v0  ;;  %v837_v24 = vadd.f32 %v836_v11, %v834_v44  ;;  %v749_v37 = vmul.f32 2.5, %v1230_v27  ;;  %v825_v25 = vmul.f32 1.25, %v1789_v4 }
 0x1dd   : > { %v874_v17 = vmul.f32 %v873_v34, %v832_v1  ;;  %v818_v35 = vmul.f32 1.25, %v1230_v27  ;;  %v823_v23 = vmul.f32 1.25, %v1231_v0  ;;  %v863_v30 = vmul.f32 0.8333333, %v1230_v27 }
 0x1de   : > { %v757_v19 = vmul.f32 %v1220_v7, %v756_v26  ;;  %v876_v28 = vmul.f32 %v875_v60, %v837_v24  ;;  %v826_v29 = vmul.f32 %v825_v25, %v768_v33  ;;  %vm693_vm15 = vcmp.ge.f32.partialorder %v1776_v41, -2.2 }
 0x1df   : > { %vm694_vm2 = vcmp.lt.f32.partialorder %v1776_v41, -1.8  ;;  %v753_v63 = vmul.f32 %v1220_v7, %v752_v16  ;;  %vm723_vm4 = vcmp.ge.f32.partialorder %v1776_v41, 0.2  ;;  %vm724_vm5 = vcmp.lt.f32.partialorder %v1776_v41, 0.6 }
 0x1e0   : > { %v761_v55 = vadd.f32 %v760_v52, %v757_v19  ;;  %vm695_vm14 = vmand %vm693_vm15, %vm694_vm2  ;;  %v877_v20 = vadd.f32 %v876_v28, %v874_v17  ;;  %v870_v22 = vmul.f32 0.8333333, %v1797_v53  ;;  %v786_v43 = vsub.f32 0.6, %v1776_v41 }
 0x1e1   : > { %v1219_v45 = vsel %vm695_vm14, 1.0, %v1969_v61  ;;  %vm725_vm3 = vmand %vm723_vm4, %vm724_vm5  ;;  %v865_v50 = vmul.f32 0.8333333, %v1789_v4  ;;  %v868_v46 = vmul.f32 0.8333333, %v1231_v0  ;;  %v838_v49 = vmul.f32 1.25, %v1800_v5 }
 0x1e2   : > { %v824_v58 = vmul.f32 %v823_v23, %v761_v55  ;;  %v750_v8 = vmul.f32 %v1219_v45, %v749_v37  ;;  %v1225_v32 = vsel %vm725_vm3, 1.0, %v1969_v61  ;;  %910 = vrot.lane.b32.xlu1 %v877_v20, %s1437_s26  ;;  %v871_v56 = vmul.f32 %v870_v22, %v832_v1 }
 0x1e3   : > { %v787_v40 = vmul.f32 2.5, %v786_v43  ;;  %v821_v31 = vmul.f32 %v820_v59, %v761_v55  ;;  %vm728_vm6 = vcmp.ge.f32.partialorder %v1776_v41, 0.6  ;;  %v839_v2 = vmul.f32 %v838_v49, %v782_v48 }
 0x1e4   : > { %v827_v6 = vadd.f32 %v826_v29, %v824_v58  ;;  %v754_v53 = vadd.f32 %v753_v63, %v750_v8  ;;  %vm729_vm0 = vcmp.lt.f32.partialorder %v1776_v41, 1.0  ;;  %v1835_v4 = vadd.f32 -0.2, %v1776_v41 }
 0x1e5   : > { %v788_v9 = vmul.f32 %v1225_v32, %v787_v40  ;;  %v840_v13 = vmul.f32 1.25, %v786_v43  ;;  %vm730_vm1 = vmand %vm728_vm6, %vm729_vm0  ;;  %v793_v33 = vsub.f32 1.0, %v1776_v41  ;;  %v878_v12 = vmul.f32 0.8333333, %v1792_v3 }
 0x1e6   : > { %v869_v36 = vmul.f32 %v868_v46, %v827_v6  ;;  %v819_v14 = vmul.f32 %v818_v35, %v754_v53  ;;  %v1226_v42 = vsel %vm730_vm1, 1.0, %v1969_v61  ;;  %v791_v47 = vmul.f32 2.5, %v1835_v4 }
 0x1e7   : > { %v789_v39 = vadd.f32 %v788_v9, %v785_v18  ;;  %v866_v21 = vmul.f32 %v865_v50, %v827_v6  ;;  %v794_v51 = vmul.f32 2.5, %v793_v33  ;;  %v879_v10 = vmul.f32 %v878_v12, %v837_v24 }
 0x1e8   : > { %v872_v38 = vadd.f32 %v871_v56, %v869_v36  ;;  %v822_v62 = vadd.f32 %v821_v31, %v819_v14  ;;  %v880_v44 = vmul.f32 0.8333333, %v786_v43  ;;  %v792_v27 = vmul.f32 %v1225_v32, %v791_v47 }
 0x1e9   : > { %v841_v48 = vmul.f32 %v840_v13, %v789_v39  ;;  %v795_v57 = vmul.f32 %v1226_v42, %v794_v51  ;;  %v843_v18 = vmul.f32 1.25, %v1809_v54  ;;  %vm733_vm12 = vcmp.ge.f32.partialorder %v1776_v41, 1.0  ;;  %v942_v51 = vld [vmem:[%s1952_s4 + $0x10] sm:$0xff] }
 0x1ea   : > { %905 = vrot.lane.b32.xlu0 %v872_v38, %s1438_s30  ;;  %v864_v52 = vmul.f32 %v863_v30, %v822_v62  ;;  %vm734_vm13 = vcmp.lt.f32.partialorder %v1776_v41, 1.4  ;;  %v1845_v0 = vadd.f32 -0.6, %v1776_v41  ;;  %v800_v1 = vsub.f32 1.4, %v1776_v41 }
 0x1eb   : > { %v842_v3 = vadd.f32 %v841_v48, %v839_v2  ;;  %v796_v34 = vadd.f32 %v795_v57, %v792_v27  ;;  %v844_v7 = vmul.f32 %v843_v18, %v789_v39  ;;  %v845_v60 = vmul.f32 1.25, %v793_v33  ;;  %vm735_vm15 = vmand %vm733_vm12, %vm734_vm13  ;;  %v940_v62 = vld [vmem:[%s1952_s4] sm:$0xff] }
 0x1ec   : > { %v867_v11 = vadd.f32 %v866_v21, %v864_v52  ;;  %v883_v26 = vmul.f32 0.8333333, %v1800_v5  ;;  %v1227_v59 = vsel %vm735_vm15, 1.0, %v1969_v61  ;;  %v798_v24 = vmul.f32 2.5, %v1845_v0  ;;  %v941_v21 = vld [vmem:[%s1952_s4 + $0x8] sm:$0xff] }
 0x1ed   : > { %v881_v16 = vmul.f32 %v880_v44, %v842_v3  ;;  %v846_v17 = vmul.f32 %v845_v60, %v796_v34  ;;  %v885_v37 = vmul.f32 0.8333333, %v793_v33  ;;  %v801_v25 = vmul.f32 2.5, %v800_v1 }
 0x1ee   : > { %903 = vst.msk [vmem:[#allocation2] sm:$0x1] %vm460_vm7, %v867_v11  ;;  %v848_v19 = vmul.f32 1.25, %v1835_v4  ;;  %v884_v23 = vmul.f32 %v883_v26, %v842_v3  ;;  %v799_v30 = vmul.f32 %v1226_v42, %v798_v24  ;;  %vm738_vm2 = vcmp.ge.f32.partialorder %v1776_v41, 1.4 }
 0x1ef   : > { %v882_v35 = vadd.f32 %v881_v16, %v879_v10  ;;  %v847_v28 = vadd.f32 %v846_v17, %v844_v7  ;;  %v802_v29 = vmul.f32 %v1227_v59, %v801_v25  ;;  %vm739_vm14 = vcmp.lt.f32.partialorder %v1776_v41, 1.8 }
 0x1f0   : > { %v1238_v5 = vadd.f32 -1.0, %v1776_v41  ;;  %v849_v55 = vmul.f32 %v848_v19, %v796_v34  ;;  %vm740_vm7 = vmand %vm738_vm2, %vm739_vm14  ;;  %v807_v63 = vsub.f32 1.8, %v1776_v41  ;;  %v850_v45 = vmul.f32 1.25, %v800_v1 }
 0x1f1   : > { %915 = vrot.lane.b32.xlu1 %v882_v35, %s1439_s6  ;;  %v886_v20 = vmul.f32 %v885_v37, %v847_v28  ;;  %v803_v22 = vadd.f32 %v802_v29, %v799_v30  ;;  %v1228_v43 = vsel %vm740_vm7, 1.0, %v1969_v61  ;;  %v888_v58 = vmul.f32 0.8333333, %v1809_v54  ;;  %s215_s6 = sand.u32 1, %s1424_s19  }
 0x1f2   : > { %v890_v50 = vmul.f32 0.8333333, %v800_v1  ;;  %v805_v8 = vmul.f32 2.5, %v1238_v5  ;;  %v808_v32 = vmul.f32 2.5, %v807_v63  ;;  %v853_v40 = vmul.f32 1.25, %v1845_v0  ;;  %s1113_s15 = scalar_lea.sflag [#allocation4], %s215_s6 }
 0x1f3   : > { %v887_v46 = vadd.f32 %v886_v20, %v884_v23  ;;  %v851_v56 = vmul.f32 %v850_v45, %v803_v22  ;;  %vm743_vm4 = vcmp.ge.f32.partialorder %v1776_v41, 1.8  ;;  %vm744_vm5 = vcmp.lt.f32.partialorder %v1776_v41, 2.2 }
 0x1f4   : > { %v806_v49 = vmul.f32 %v1227_v59, %v805_v8  ;;  %v809_v6 = vmul.f32 %v1228_v43, %v808_v32  ;;  %v1239_v53 = vadd.f32 -1.4, %v1776_v41  ;;  %v889_v9 = vmul.f32 %v888_v58, %v847_v28  ;;  %vm745_vm3 = vmand %vm743_vm4, %vm744_vm5 }
 0x1f5   : > { %920 = vrot.lane.b32.xlu1 %v887_v46, %s1440_s7  ;;  %v852_v31 = vadd.f32 %v851_v56, %v849_v55  ;;  %v855_v54 = vmul.f32 1.25, %v807_v63  ;;  %v814_v2 = vsub.f32 2.2, %v1776_v41  ;;  %v854_v14 = vmul.f32 %v853_v40, %v803_v22  ;;  %v692_v22 = vld [vmem:[%s1951_s3] sm:$0xf]  ;;  %s1190_s7 = sshll.u32 %s215_s6, 3 }
 0x1f6   : > { %v810_v36 = vadd.f32 %v809_v6, %v806_v49  ;;  %v1229_v13 = vsel %vm745_vm3, 1.0, %v1969_v61  ;;  %v812_v33 = vmul.f32 2.5, %v1239_v53  ;;  %v893_v47 = vmul.f32 0.8333333, %v1835_v4  ;;  %v943_v4 = vld [vmem:[%s1952_s4 + $0x18] sm:$0xff]  ;;  %s217_s10 = scalar_lea.vmem [#allocation3], %s1190_s7 }
 0x1f7   : > { %v891_v39 = vmul.f32 %v890_v50, %v852_v31  ;;  %v815_v12 = vmul.f32 2.5, %v814_v2  ;;  %v858_v44 = vmul.f32 1.25, %v1238_v5  ;;  %v1303_v27 = vpack.c.bf16 %v941_v21, %v940_v62  ;;  %s1127_s11 = sshll.u32 %s217_s10, 4  ;;  %s1908_s11 = int_to_ptr.vmem [resolvable:$true] %s1127_s11 }
 0x1f8   : > { %v856_v42 = vmul.f32 %v855_v54, %v810_v36  ;;  %v813_v38 = vmul.f32 %v1228_v43, %v812_v33  ;;  %v894_v57 = vmul.f32 %v893_v47, %v852_v31  ;;  %v895_v18 = vmul.f32 0.8333333, %v807_v63  ;;  %s1370_s16 = scalar_lea.vmem %s1908_s11, 128 }
 0x1f9   : > { %v892_v48 = vadd.f32 %v891_v39, %v889_v9  ;;  %v816_v10 = vmul.f32 %v1229_v13, %v815_v12  ;;  %v859_v1 = vmul.f32 %v858_v44, %v810_v36  ;;  %v860_v11 = vmul.f32 1.25, %v814_v2  ;;  %1304 = vmatpush3.bf16.msra.mxu1 %v1303_v27  ;;  %p1371_p11 = scmp.ne.s32.totalorder %s1908_s11, %s1370_s16 }
 0x1fa   : > { %v857_v52 = vadd.f32 %v856_v42, %v854_v14  ;;  %v1306_v34 = vpack.c.bf16 %v943_v4, %v942_v51  ;;  %v1970_v60 = vmov 0.0|0.0   ;;  %v898_v26 = vmul.f32 0.8333333, %v1845_v0 }
 0x1fb   : > { %925 = vrot.lane.b32.xlu1 %v892_v48, %s1441_s17  ;;  %v817_v3 = vadd.f32 %v816_v10, %v813_v38  ;;  %1305 = vmatprep.subr.bf16.mxu1 %v1970_v60  ;;  %v900_v37 = vmul.f32 0.8333333, %v814_v2  ;;  %v1218_v0 = vmul.f32 -1.442695, %v1776_v41  ;;  %vm1971_vm6 = vcmask 188576   ;;  %v1369_v2 = vld [vmem:[%s1529_s9] sm:$0xff]  ;;  %p1372_p12 = pnand %p1371_p11, %p1514_p5 }
 0x1fc   : > { %v896_v7 = vmul.f32 %v895_v18, %v857_v52  ;;  %v899_v17 = vmul.f32 %v898_v26, %v857_v52  ;;  %vm1972_vm0 = vcmask 221376   ;;  %vm1977_vm1 = vcmask 31744   ;;  %s1374_s9 = sshll.u32 %s1445_s22, 4  ;;  %s1375_s9 = int_to_ptr.vmem [resolvable:$false] %s1374_s9 }
 0x1fd   : > { %v861_v16 = vmul.f32 %v860_v11, %v817_v3  ;;  %1307 = vmatpush3.bf16.msra.mxu1 %v1306_v34  ;;  %1365 = vpow2.f32 %v1218_v0  ;;  %v1096_v40 = vsub.s32 0, %v1554_v15  ;;  %v1444_v53 = vmov 839922192   ;;  %p1373_p13 = pneg %p1372_p12  ;;  %s1376_s17 = scalar_lea.vmem %s1375_s9, 256 }
 0x1fe   : > { %v897_v59 = vadd.f32 %v896_v7, %v894_v57  ;;  %1291 = vmatprep.subr.mxu1 %v1969_v61  ;;  %v1103_v31 = vunpack.c.l.s4 %v1444_v53  ;;  %p1377_p0 = scmp.lt.s32.totalorder %s1908_s11, %s1375_s9  ;;  %p1378_p1 = scmp.lt.s32.totalorder %s1376_s17, %s1370_s16 }
 0x1ff   : > { %v862_v24 = vadd.f32 %v861_v16, %v859_v1 }
 0x200   : > { %930 = vrot.lane.b32.xlu1 %v897_v59, %s1442_s23  ;;  %p1379_p2 = por %p1378_p1, %p1377_p0 }
 0x201   : > { %v901_v25 = vmul.f32 %v900_v37, %v862_v24 }
 0x202   : > { %p1380_p3 = pnand %p1379_p2, %p1373_p13 }
 0x203   : > { %v902_v19 = vadd.f32 %v901_v25, %v899_v17 }
 0x205   : > { %935 = vrot.lane.b32.xlu1 %v902_v19, %s1443_s25 }
 0x207   : > { %v1366_v5 = vpop.eup %1365 }
 0x208   : > { %v688_v55 = vadd.f32 1.0, %v1366_v5 }
 0x20a   : > { %1367 = vrcp.f32 %v688_v55 }
 0x214   : > { %v1368_v45 = vpop.eup %1367 }
 0x215   : > { %v691_v58 = vmul.f32 %v1368_v45, %v1776_v41 }
 0x254   : > { %v911_v35 = vpop.permute.xlu1 %910 }
 0x25c   : > { %v906_v23 = vpop.permute.xlu0 %905 }
 0x25d   : > { %908 = vst.msk [vmem:[#allocation2] sm:$0x1] %vm469_vm9, %v906_v23  ;;  %vm1973_vm9 = vcmask 254176  }
 0x25e   : > { %913 = vst.msk [vmem:[#allocation2] sm:$0x1] %vm478_vm8, %v911_v35  ;;  %vm1974_vm8 = vcmask 261120  }
 0x263   : > { %v916_v30 = vpop.permute.xlu1 %915 }
 0x264   : > { %918 = vst.msk [vmem:[#allocation2] sm:$0x1] %vm487_vm10, %v916_v30  ;;  %vm1975_vm10 = vcmask 1043456  }
 0x267   : > { %v921_v28 = vpop.permute.xlu1 %920 }
 0x268   : > { %923 = vst.msk [vmem:[#allocation2] sm:$0x1] %vm496_vm11, %v921_v28  ;;  %vm1976_vm11 = vmmov 0  }
 0x26d   : > { %v926_v29 = vpop.permute.xlu1 %925 }
 0x26e   : > { %928 = vst.msk [vmem:[#allocation2] sm:$0x1] %vm1971_vm6, %v926_v29 }
 0x272   : > { %v931_v63 = vpop.permute.xlu1 %930 }
 0x273   : > { %933 = vst.msk [vmem:[#allocation2] sm:$0x1] %vm1972_vm0, %v931_v63 }
 0x277   : > { %v936_v20 = vpop.permute.xlu1 %935 }
 0x278   : > { %938 = vst.msk [vmem:[#allocation2] sm:$0x1] %vm1973_vm9, %v936_v20 }
 0x27f   : > { %v939_v43 = vld [vmem:[#allocation2] sm:$0x1] }
 0x280   : > { %1289 = vmatmul.mubr.msk.f32.vlgmr.msra.gmra.mrb[0].mxu1 %vm1974_vm8, %v939_v43 }
 0x281   : > { %1292 = vmatpush3.msk.msra.mxu1 %vm1975_vm10, %v692_v22  ;;  %1293 = vmatprep.mubr.msk.f32.mxu1 %vm1976_vm11, %v1969_v61  ;;  %v1104_v61 = vunpack.c.0.s8 %v1103_v31 }
 0x283   : > { %v1107_v41 = vsub.s32 %v1104_v61, %v1554_v15 }
 0x284   : > { %1294 = vmatmul.mubr.msk.f32.vlgmr.msra.gmra.mrb[2].mxu1 %vm1977_vm1, %v691_v58 }
 0x353   : > { %v1013_v50 = vpop.f32.mrb[0].mxu1 }
 0x354   : > { %v1290_v8 = vpop.f32.mrb[1].mxu1 }
 0x357   : > { %v1089_v32 = vpop.f32.mrb[2].mxu1 }
 0x358   : > { %v1090_v46 = vadd.f32 %v1089_v32, %v1013_v50  ;;  %v1295_v56 = vpop.f32.mrb[3].mxu1 }
 0x35a   : > { %v1093_v49 = vadd.f32 1.0, %v1090_v46 }
 0x35c   : > { %v1097_v6 = vrot.slane %v1093_v49, %v1096_v40 }
 0x35e   : > { %1099 = vbcast.lane.b32.xlu1 %v1097_v6, 256 }
 0x3d0   : > { %v1100_v9 = vpop.permute.xlu1 %1099 }
 0x3d1   : > { %v1108_v54 = vrot.slane %v1100_v9, %v1107_v41 }
 0x3d3   : > { %v1110_v36 = vmul.f32 %v1369_v2, %v1108_v54 }
 0x3d5   : > { %1111 = vst [vmem:[%s217_s10] sm:$0xff] %v1110_v36 }
 0x3d6   : > { %1383 = shalt.err (!%p1380_p3)
}
 0x3d7   : > { %s1384_s23 = scalar_lea.hbm %s1906_s14, 128  ;;  %s1388_s30 = scalar_lea.hbm %s1953_s5, 256 }
 0x3d8   : > { %p1385_p4 = scmp.ne.s32.totalorder %s1906_s14, %s1384_s23  ;;  %p1389_p9 = scmp.lt.u32.totalorder %s1906_s14, %s1953_s5 }
 0x3d9   : > { %p1390_p10 = scmp.lt.u32.totalorder %s1388_s30, %s1384_s23  ;;  %p1392_p12 = scmp.lt.u32.totalorder %s1384_s23, %s1906_s14 }
 0x3da   : > { %p1386_p7 = pnand %p1385_p4, %p1514_p5 }
 0x3db   : > { %p1391_p11 = por %p1390_p10, %p1389_p9 }
 0x3dc   : > { %p1387_p8 = pneg %p1386_p7 }
 0x3dd   : > { %p1393_p13 = por %p1392_p12, %p1391_p11 }
 0x3df   : > { %p1394_p0 = pnand %p1393_p13, %p1387_p8 }
 0x3e1   : > { %1397 = shalt.err (!%p1394_p0)
}
 0x3e2   : > { %1310 = dma.vmem_to_hbm [thread:$0]  (%p1514_p5), %s1908_s11, 128, %s1906_s14, %s1113_s15  }
 0x3e3 PF: > { %p1316_p1 = scmp.ge.s32.totalorder %s1432_s21, 2  ;;  %s1139_s8 = sand.u32 1, %s1420_s18  }
 0x3e4   : > { %s1140_s10 = scalar_lea.sflag [#allocation4], %s1139_s8 }
 0x3e5   : > { %p1313_p2 = pnand %p1316_p1, %p1518_p6 }
 0x3e7   : > { %1415 = dma.done.wait (!%p1313_p2), %s1140_s10, 128  }
 0x3e8   : > { %1417 = vsyncadd (!%p1313_p2), %s1140_s10, 4294967168  ;;  %p15_p3 = scmp.ge.s32.totalorder %s1501_s24, 4   ;;  %s1978_s18 = smov %s1424_s19 }
 0x3e9   : > { %s1979_s19 = smov %s1428_s20  ;;  %s1980_s20 = smov %s1512_s27 }
 0x3ea   : > { %s1981_s21 = smov %s1501_s24  ;;  %17 = sbr.rel (!%p15_p3) target bundleno = 3 (0x3), region = 75 }
 0x3f1   :  { %1145 = vsyncpa [#allocation4], 1 }
 0x3f2   :  { %1147 = vsyncpa [#allocation4 + $0x1], 1 }

</bundles_post_ra>
